<compile_context>
chip_gen: v7x
topology: tpu7x:2x2x1
jax: 0.10.0
libtpu: 0.0.40
codegen_flags: <defaults>
</compile_context>

<pallas_src>
import functools
import math

import jax
import jax.numpy as jnp
from jax import lax
from jax.experimental import pallas as pl
from jax.experimental.pallas import tpu as pltpu


def input_self_attention_kernel(xq_ref, xkv_ref, mask_ref,
                                wq_ref, bq_ref, wkv_ref, bkv_ref,
                                wo_ref, bo_ref, wd_ref, bd_ref,
                                gamma_ref, beta_ref,
                                out_ref, *, num_heads, eps):
    """One grid step = one (batch, query-block) tile.

    xq_ref    : (Tq, H) f32   query rows of this block (also residual / LN input)
    xkv_ref   : (S,  H) f32   full sequence for K/V
    mask_ref  : (1,  S) f32   key padding mask (nonzero = ignore key)
    wq_ref    : (H,  H) bf16  Q weight, pre-transposed, 1/sqrt(d) folded in
    bq_ref    : (1,  H) f32   Q bias (scaled)
    wkv_ref   : (H, 2H) bf16  fused K/V weight, pre-transposed
    bkv_ref   : (1, 2H) f32   fused K/V bias
    wo_ref    : (H,  H) bf16  out_proj weight, pre-transposed
    bo_ref    : (1,  H) f32
    wd_ref    : (H,  H) bf16  BertSelfOutput.dense weight, pre-transposed
    bd_ref    : (1,  H) f32
    gamma_ref : (1,  H) f32   LayerNorm weight
    beta_ref  : (1,  H) f32   LayerNorm bias
    out_ref   : (Tq, H) f32
    """
    xq_f32 = xq_ref[...]                         # keep f32 copy for residual / LN
    xq = xq_f32.astype(jnp.bfloat16)
    xkv = xkv_ref[...].astype(jnp.bfloat16)

    Tq, H = xq_f32.shape
    d = H // num_heads

    # Projections (bf16 operands, f32 accumulation). Q scale is pre-folded.
    q = jnp.dot(xq, wq_ref[...], preferred_element_type=jnp.float32) + bq_ref[...]
    kv = jnp.dot(xkv, wkv_ref[...], preferred_element_type=jnp.float32) + bkv_ref[...]
    k = kv[:, :H]
    v = kv[:, H:]

    # Additive key-padding bias, broadcast over query rows (kept in f32).
    key_bias = mask_ref[...] * jnp.float32(-1e30)            # (1, S)

    # Per-head attention; num_heads is static -> unrolled loop with static lane slices.
    # Each head's context is folded straight into the output projection (no concat).
    attn_out = jnp.zeros((Tq, H), jnp.float32)
    for h in range(num_heads):
        sl = slice(h * d, (h + 1) * d)
        qh = q[:, sl].astype(jnp.bfloat16)
        kh = k[:, sl].astype(jnp.bfloat16)
        vh = v[:, sl].astype(jnp.bfloat16)
        # scores = qh @ kh^T via contraction on the head dim (f32 accumulation).
        s = lax.dot_general(qh, kh, (((1,), (1,)), ((), ())),
                            preferred_element_type=jnp.float32) + key_bias
        s = s - jnp.max(s, axis=-1, keepdims=True)
        p = jnp.exp(s)                                        # unnormalized probs (f32)
        inv = pl.reciprocal(jnp.sum(p, axis=-1, keepdims=True), approx=True)  # (Tq, 1)
        ctx = jnp.dot(p.astype(jnp.bfloat16), vh,
                      preferred_element_type=jnp.float32) * inv               # (Tq, d)
        attn_out = attn_out + jnp.dot(ctx.astype(jnp.bfloat16), wo_ref[sl, :],
                                      preferred_element_type=jnp.float32)
    attn_out = attn_out + bo_ref[...]

    # BertSelfOutput: dense -> (dropout = identity) -> LayerNorm(dense + input_tensor)
    dense = jnp.dot(attn_out.astype(jnp.bfloat16), wd_ref[...],
                    preferred_element_type=jnp.float32) + bd_ref[...]
    ln_in = dense + xq_f32
    mean = jnp.mean(ln_in, axis=-1, keepdims=True)
    xc = ln_in - mean
    var = jnp.mean(xc * xc, axis=-1, keepdims=True)
    ln = xc * lax.rsqrt(var + eps) * gamma_ref[...] + beta_ref[...]

    # attention_output = output + self.output(output, input_tensor)
    out_ref[...] = (attn_out + ln).astype(out_ref.dtype)


def prepare_params(params, *, num_heads):
    """One-time, batch-independent weight transforms (transpose, bf16 cast, scale fold).

    Call once and reuse across invocations so no HBM-level transpose/convert ops are
    emitted per call.
    """
    H = params["out_proj_weight"].shape[0]
    d = H // num_heads
    scale = jnp.float32(1.0 / math.sqrt(d))

    w_in = params["in_proj_weight"].astype(jnp.float32)      # (3H, H), rows = [Wq; Wk; Wv]
    b_in = params["in_proj_bias"].astype(jnp.float32)        # (3H,)
    return {
        "wq": (w_in[:H] * scale).T.astype(jnp.bfloat16),                     # (H, H)
        "bq": (b_in[:H] * scale).reshape(1, H).astype(jnp.float32),          # (1, H)
        "wkv": w_in[H:].T.astype(jnp.bfloat16),                              # (H, 2H)
        "bkv": b_in[H:].reshape(1, 2 * H).astype(jnp.float32),               # (1, 2H)
        "wo": params["out_proj_weight"].T.astype(jnp.bfloat16),              # (H, H)
        "bo": params["out_proj_bias"].reshape(1, H).astype(jnp.float32),
        "wd": params["dense_weight"].T.astype(jnp.bfloat16),                 # (H, H)
        "bd": params["dense_bias"].reshape(1, H).astype(jnp.float32),
        "gamma": params["ln_weight"].reshape(1, H).astype(jnp.float32),
        "beta": params["ln_bias"].reshape(1, H).astype(jnp.float32),
    }


def _vmem_limit_bytes(S, H, block_q):
    # weights (bf16, single-buffered) + biases / LN params (f32)
    w = 5 * H * H * 2 + 9 * H * 4
    # double-buffered I/O tiles: xq, xkv, mask, out
    io = 2 * (block_q * H * 4 + S * H * 4 + S * 4 + block_q * H * 4)
    # in-kernel f32 temporaries: q + kv, per-head scores/probs, attn_out/dense/ln
    scratch = (block_q * H + S * 2 * H) * 4 + 3 * block_q * S * 4 + 4 * block_q * H * 4
    total = w + io + scratch
    return max(16 << 20, min(2 * total + (4 << 20), 64 << 20))


def input_self_attention(input_tensor, input_mask, prep, *, num_heads,
                         eps=1e-12, block_q=None):
    """input_tensor: (B, S, H) f32; input_mask: (B, 1, 1, S), nonzero = padded key."""
    B, S, H = input_tensor.shape
    assert H % num_heads == 0, "hidden_size must be divisible by num_attention_heads"
    if block_q is None:
        block_q = S
    assert S % block_q == 0

    x = input_tensor.astype(jnp.float32)
    # key_padding_mask = input_mask.bool().squeeze(1).squeeze(1) -> keep (B, 1, S) float view.
    key_pad = (input_mask.reshape(B, 1, S) != 0).astype(jnp.float32)

    kernel = functools.partial(input_self_attention_kernel,
                               num_heads=num_heads, eps=eps)
    const = lambda b, qi: (0, 0)
    wspec = lambda shape: pl.BlockSpec(shape, const, pipeline_mode=pl.Buffered(1))

    out = pl.pallas_call(
        kernel,
        out_shape=jax.ShapeDtypeStruct((B, S, H), jnp.float32),
        grid=(B, S // block_q),
        in_specs=[
            pl.BlockSpec((None, block_q, H), lambda b, qi: (b, qi, 0)),  # x (query block)
            pl.BlockSpec((None, S, H), lambda b, qi: (b, 0, 0)),         # x (full seq for K/V)
            pl.BlockSpec((None, 1, S), lambda b, qi: (b, 0, 0)),         # key padding mask
            wspec((H, H)),        # wq (scale folded)
            wspec((1, H)),        # bq
            wspec((H, 2 * H)),    # wkv
            wspec((1, 2 * H)),    # bkv
            wspec((H, H)),        # wo
            wspec((1, H)),        # bo
            wspec((H, H)),        # wd
            wspec((1, H)),        # bd
            wspec((1, H)),        # gamma
            wspec((1, H)),        # beta
        ],
        out_specs=pl.BlockSpec((None, block_q, H), lambda b, qi: (b, qi, 0)),
        compiler_params=pltpu.CompilerParams(
            dimension_semantics=("parallel", "parallel"),
            vmem_limit_bytes=_vmem_limit_bytes(S, H, block_q)),
    )(x, x, key_pad,
      prep["wq"], prep["bq"], prep["wkv"], prep["bkv"],
      prep["wo"], prep["bo"], prep["wd"], prep["bd"],
      prep["gamma"], prep["beta"])
    return out


if __name__ == "__main__":
    # Small synthetic config consistent with the module
    # (hidden_size=32, num_attention_heads=4, batch=2, seq=8).
    B, S, H, num_heads = 2, 8, 32, 4
    layer_norm_eps = 1e-12

    key = jax.random.PRNGKey(0)
    ks = jax.random.split(key, 7)
    std = 0.02
    params = {
        "in_proj_weight": jax.random.normal(ks[0], (3 * H, H), jnp.float32) * std,
        "in_proj_bias": jax.random.normal(ks[1], (3 * H,), jnp.float32) * std,
        "out_proj_weight": jax.random.normal(ks[2], (H, H), jnp.float32) * std,
        "out_proj_bias": jax.random.normal(ks[3], (H,), jnp.float32) * std,
        "dense_weight": jax.random.normal(ks[4], (H, H), jnp.float32) * std,
        "dense_bias": jax.random.normal(ks[5], (H,), jnp.float32) * std,
        "ln_weight": jnp.ones((H,), jnp.float32),
        "ln_bias": jnp.zeros((H,), jnp.float32),
    }
    x = jax.random.normal(ks[6], (B, S, H), jnp.float32)

    # input_mask in the module's (B, 1, 1, S) layout; nonzero = padded key (ignored).
    mask2d = jnp.zeros((B, S), jnp.int32).at[1, S - 2:].set(1)
    input_mask = mask2d.reshape(B, 1, 1, S)

    prep = prepare_params(params, num_heads=num_heads)   # one-time weight layout transforms
    out = input_self_attention(x, input_mask, prep,
                               num_heads=num_heads, eps=layer_norm_eps)
    out = jax.block_until_ready(out)

    # ---------------- pure-JAX f32 reference ----------------
    d = H // num_heads
    qkv = jnp.einsum("bsh,kh->bsk", x, params["in_proj_weight"]) + params["in_proj_bias"]
    q, k, v = qkv[..., :H], qkv[..., H:2 * H], qkv[..., 2 * H:]

    def split_heads(t):
        return t.reshape(B, S, num_heads, d).transpose(0, 2, 1, 3)

    qh, kh, vh = split_heads(q), split_heads(k), split_heads(v)
    scores = jnp.einsum("bhqd,bhkd->bhqk", qh, kh) / jnp.sqrt(jnp.float32(d))
    bias = mask2d.astype(jnp.float32)[:, None, None, :] * (-1e30)
    probs = jax.nn.softmax(scores + bias, axis=-1)
    ctx = jnp.einsum("bhqk,bhkd->bhqd", probs, vh).transpose(0, 2, 1, 3).reshape(B, S, H)
    attn_out = ctx @ params["out_proj_weight"].T + params["out_proj_bias"]
    dense = attn_out @ params["dense_weight"].T + params["dense_bias"]
    ln_in = dense + x
    mean = ln_in.mean(-1, keepdims=True)
    var = ((ln_in - mean) ** 2).mean(-1, keepdims=True)
    ln = (ln_in - mean) * jax.lax.rsqrt(var + layer_norm_eps) * params["ln_weight"] + params["ln_bias"]
    ref = attn_out + ln

    assert out.shape == (B, S, H)
    err = jnp.max(jnp.abs(out - ref))
    # bf16 matmul operands + approx reciprocal => slightly looser tolerance than pure-f32.
    assert jnp.allclose(out, ref, atol=1e-2, rtol=1e-2), f"mismatch vs reference, max abs err={err}"
    print("KERNEL_OK")
</pallas_src>

<mosaic_0001>
module attributes {stable_mosaic.version = 11 : i64} {
  func.func @input_self_attention_kernel(%arg0: i32, %arg1: i32, %arg2: memref<1x8x32xf32, #tpu.memory_space<vmem>>, %arg3: memref<1x8x32xf32, #tpu.memory_space<vmem>>, %arg4: memref<1x1x8xf32, #tpu.memory_space<vmem>>, %arg5: memref<32x32xbf16, #tpu.memory_space<vmem>>, %arg6: memref<1x32xf32, #tpu.memory_space<vmem>>, %arg7: memref<32x64xbf16, #tpu.memory_space<vmem>>, %arg8: memref<1x64xf32, #tpu.memory_space<vmem>>, %arg9: memref<32x32xbf16, #tpu.memory_space<vmem>>, %arg10: memref<1x32xf32, #tpu.memory_space<vmem>>, %arg11: memref<32x32xbf16, #tpu.memory_space<vmem>>, %arg12: memref<1x32xf32, #tpu.memory_space<vmem>>, %arg13: memref<1x32xf32, #tpu.memory_space<vmem>>, %arg14: memref<1x32xf32, #tpu.memory_space<vmem>>, %arg15: memref<1x8x32xf32, #tpu.memory_space<vmem>>) attributes {dimension_semantics = [#tpu.dimension_semantics<parallel>, #tpu.dimension_semantics<parallel>], iteration_bounds = array<i64: 2, 1>, scalar_prefetch = 0 : i64, scratch_operands = 0 : i64, tpu.core_type = #tpu.core_type<tc>, window_params = [{transform_indices = @transform_0, window_bounds = array<i64: 1, 8, 32>}, {transform_indices = @transform_1, window_bounds = array<i64: 1, 8, 32>}, {transform_indices = @transform_2, window_bounds = array<i64: 1, 1, 8>}, {pipeline_mode = #tpu.pipeline_mode<synchronous>, transform_indices = @transform_3, window_bounds = array<i64: 32, 32>}, {pipeline_mode = #tpu.pipeline_mode<synchronous>, transform_indices = @transform_4, window_bounds = array<i64: 1, 32>}, {pipeline_mode = #tpu.pipeline_mode<synchronous>, transform_indices = @transform_5, window_bounds = array<i64: 32, 64>}, {pipeline_mode = #tpu.pipeline_mode<synchronous>, transform_indices = @transform_6, window_bounds = array<i64: 1, 64>}, {pipeline_mode = #tpu.pipeline_mode<synchronous>, transform_indices = @transform_7, window_bounds = array<i64: 32, 32>}, {pipeline_mode = #tpu.pipeline_mode<synchronous>, transform_indices = @transform_8, window_bounds = array<i64: 1, 32>}, {pipeline_mode = #tpu.pipeline_mode<synchronous>, transform_indices = @transform_9, window_bounds = array<i64: 32, 32>}, {pipeline_mode = #tpu.pipeline_mode<synchronous>, transform_indices = @transform_10, window_bounds = array<i64: 1, 32>}, {pipeline_mode = #tpu.pipeline_mode<synchronous>, transform_indices = @transform_11, window_bounds = array<i64: 1, 32>}, {pipeline_mode = #tpu.pipeline_mode<synchronous>, transform_indices = @transform_12, window_bounds = array<i64: 1, 32>}, {transform_indices = @transform_13, window_bounds = array<i64: 1, 8, 32>}]} {
    %c0 = arith.constant 0 : index
    %c0_0 = arith.constant 0 : index
    %c0_1 = arith.constant 0 : index
    %0 = vector.load %arg2[%c0, %c0_0, %c0_1] : memref<1x8x32xf32, #tpu.memory_space<vmem>>, vector<1x8x32xf32>
    %1 = vector.shape_cast %0 : vector<1x8x32xf32> to vector<8x32xf32>
    %2 = arith.truncf %1 : vector<8x32xf32> to vector<8x32xbf16>
    %c0_2 = arith.constant 0 : index
    %c0_3 = arith.constant 0 : index
    %c0_4 = arith.constant 0 : index
    %3 = vector.load %arg3[%c0_2, %c0_3, %c0_4] : memref<1x8x32xf32, #tpu.memory_space<vmem>>, vector<1x8x32xf32>
    %4 = vector.shape_cast %3 : vector<1x8x32xf32> to vector<8x32xf32>
    %5 = arith.truncf %4 : vector<8x32xf32> to vector<8x32xbf16>
    %c0_5 = arith.constant 0 : index
    %c0_6 = arith.constant 0 : index
    %6 = vector.load %arg5[%c0_5, %c0_6] : memref<32x32xbf16, #tpu.memory_space<vmem>>, vector<32x32xbf16>
    %cst = arith.constant dense<0.000000e+00> : vector<8x32xf32>
    %7 = tpu.matmul %2, %6, %cst {dimension_numbers = #tpu.dot_dimension_numbers<[1], [0], [0], [1], [0, 0, 1, 1], [], []>} : vector<8x32xbf16>, vector<32x32xbf16>, vector<8x32xf32> -> vector<8x32xf32>
    %c0_7 = arith.constant 0 : index
    %c0_8 = arith.constant 0 : index
    %8 = vector.load %arg6[%c0_7, %c0_8] : memref<1x32xf32, #tpu.memory_space<vmem>>, vector<1x32xf32>
    %9 = vector.broadcast %8 : vector<1x32xf32> to vector<8x32xf32>
    %10 = arith.addf %7, %9 : vector<8x32xf32>
    %c0_9 = arith.constant 0 : index
    %c0_10 = arith.constant 0 : index
    %11 = vector.load %arg7[%c0_9, %c0_10] : memref<32x64xbf16, #tpu.memory_space<vmem>>, vector<32x64xbf16>
    %cst_11 = arith.constant dense<0.000000e+00> : vector<8x64xf32>
    %12 = tpu.matmul %5, %11, %cst_11 {dimension_numbers = #tpu.dot_dimension_numbers<[1], [0], [0], [1], [0, 0, 1, 1], [], []>} : vector<8x32xbf16>, vector<32x64xbf16>, vector<8x64xf32> -> vector<8x64xf32>
    %c0_12 = arith.constant 0 : index
    %c0_13 = arith.constant 0 : index
    %13 = vector.load %arg8[%c0_12, %c0_13] : memref<1x64xf32, #tpu.memory_space<vmem>>, vector<1x64xf32>
    %14 = vector.broadcast %13 : vector<1x64xf32> to vector<8x64xf32>
    %15 = arith.addf %12, %14 : vector<8x64xf32>
    %16 = vector.extract_strided_slice %15 {offsets = [0, 0], sizes = [8, 32], strides = [1, 1]} : vector<8x64xf32> to vector<8x32xf32>
    %17 = vector.extract_strided_slice %15 {offsets = [0, 32], sizes = [8, 32], strides = [1, 1]} : vector<8x64xf32> to vector<8x32xf32>
    %c0_14 = arith.constant 0 : index
    %c0_15 = arith.constant 0 : index
    %c0_16 = arith.constant 0 : index
    %18 = vector.load %arg4[%c0_14, %c0_15, %c0_16] : memref<1x1x8xf32, #tpu.memory_space<vmem>>, vector<1x1x8xf32>
    %19 = vector.shape_cast %18 : vector<1x1x8xf32> to vector<1x8xf32>
    %cst_17 = arith.constant -1.000000e+30 : f32
    %20 = vector.broadcast %cst_17 : f32 to vector<1x8xf32>
    %21 = arith.mulf %19, %20 : vector<1x8xf32>
    %cst_18 = arith.constant 0.000000e+00 : f32
    %22 = vector.broadcast %cst_18 : f32 to vector<8x32xf32>
    %23 = vector.extract_strided_slice %10 {offsets = [0, 0], sizes = [8, 8], strides = [1, 1]} : vector<8x32xf32> to vector<8x8xf32>
    %24 = arith.truncf %23 : vector<8x8xf32> to vector<8x8xbf16>
    %25 = vector.extract_strided_slice %16 {offsets = [0, 0], sizes = [8, 8], strides = [1, 1]} : vector<8x32xf32> to vector<8x8xf32>
    %26 = arith.truncf %25 : vector<8x8xf32> to vector<8x8xbf16>
    %27 = vector.extract_strided_slice %17 {offsets = [0, 0], sizes = [8, 8], strides = [1, 1]} : vector<8x32xf32> to vector<8x8xf32>
    %28 = arith.truncf %27 : vector<8x8xf32> to vector<8x8xbf16>
    %cst_19 = arith.constant dense<0.000000e+00> : vector<8x8xf32>
    %29 = tpu.matmul %24, %26, %cst_19 {dimension_numbers = #tpu.dot_dimension_numbers<[1], [1], [0], [0], [0, 0, 1, 0], [], []>} : vector<8x8xbf16>, vector<8x8xbf16>, vector<8x8xf32> -> vector<8x8xf32>
    %30 = vector.broadcast %21 : vector<1x8xf32> to vector<8x8xf32>
    %31 = arith.addf %29, %30 : vector<8x8xf32>
    %cst_20 = arith.constant dense<0xFF800000> : vector<8xf32>
    %32 = vector.multi_reduction <maximumf>, %31, %cst_20 [1] : vector<8x8xf32> to vector<8xf32>
    %33 = vector.shape_cast %32 : vector<8xf32> to vector<8x1xf32>
    %34 = vector.broadcast %33 : vector<8x1xf32> to vector<8x8xf32>
    %35 = arith.subf %31, %34 : vector<8x8xf32>
    %36 = math.exp %35 : vector<8x8xf32>
    %cst_21 = arith.constant dense<0.000000e+00> : vector<8xf32>
    %37 = vector.multi_reduction <add>, %36, %cst_21 [1] : vector<8x8xf32> to vector<8xf32>
    %38 = vector.shape_cast %37 : vector<8xf32> to vector<8x1xf32>
    %39 = tpu.reciprocal %38 {approx = true} : vector<8x1xf32> -> vector<8x1xf32>
    %40 = arith.truncf %36 : vector<8x8xf32> to vector<8x8xbf16>
    %cst_22 = arith.constant dense<0.000000e+00> : vector<8x8xf32>
    %41 = tpu.matmul %40, %28, %cst_22 {dimension_numbers = #tpu.dot_dimension_numbers<[1], [0], [0], [1], [0, 0, 1, 1], [], []>} : vector<8x8xbf16>, vector<8x8xbf16>, vector<8x8xf32> -> vector<8x8xf32>
    %42 = vector.broadcast %39 : vector<8x1xf32> to vector<8x8xf32>
    %43 = arith.mulf %41, %42 : vector<8x8xf32>
    %44 = arith.truncf %43 : vector<8x8xf32> to vector<8x8xbf16>
    %c0_23 = arith.constant 0 : index
    %c0_24 = arith.constant 0 : index
    %45 = vector.load %arg9[%c0_23, %c0_24] : memref<32x32xbf16, #tpu.memory_space<vmem>>, vector<8x32xbf16>
    %cst_25 = arith.constant dense<0.000000e+00> : vector<8x32xf32>
    %46 = tpu.matmul %44, %45, %cst_25 {dimension_numbers = #tpu.dot_dimension_numbers<[1], [0], [0], [1], [0, 0, 1, 1], [], []>} : vector<8x8xbf16>, vector<8x32xbf16>, vector<8x32xf32> -> vector<8x32xf32>
    %47 = arith.addf %22, %46 : vector<8x32xf32>
    %48 = vector.extract_strided_slice %10 {offsets = [0, 8], sizes = [8, 8], strides = [1, 1]} : vector<8x32xf32> to vector<8x8xf32>
    %49 = arith.truncf %48 : vector<8x8xf32> to vector<8x8xbf16>
    %50 = vector.extract_strided_slice %16 {offsets = [0, 8], sizes = [8, 8], strides = [1, 1]} : vector<8x32xf32> to vector<8x8xf32>
    %51 = arith.truncf %50 : vector<8x8xf32> to vector<8x8xbf16>
    %52 = vector.extract_strided_slice %17 {offsets = [0, 8], sizes = [8, 8], strides = [1, 1]} : vector<8x32xf32> to vector<8x8xf32>
    %53 = arith.truncf %52 : vector<8x8xf32> to vector<8x8xbf16>
    %cst_26 = arith.constant dense<0.000000e+00> : vector<8x8xf32>
    %54 = tpu.matmul %49, %51, %cst_26 {dimension_numbers = #tpu.dot_dimension_numbers<[1], [1], [0], [0], [0, 0, 1, 0], [], []>} : vector<8x8xbf16>, vector<8x8xbf16>, vector<8x8xf32> -> vector<8x8xf32>
    %55 = vector.broadcast %21 : vector<1x8xf32> to vector<8x8xf32>
    %56 = arith.addf %54, %55 : vector<8x8xf32>
    %cst_27 = arith.constant dense<0xFF800000> : vector<8xf32>
    %57 = vector.multi_reduction <maximumf>, %56, %cst_27 [1] : vector<8x8xf32> to vector<8xf32>
    %58 = vector.shape_cast %57 : vector<8xf32> to vector<8x1xf32>
    %59 = vector.broadcast %58 : vector<8x1xf32> to vector<8x8xf32>
    %60 = arith.subf %56, %59 : vector<8x8xf32>
    %61 = math.exp %60 : vector<8x8xf32>
    %cst_28 = arith.constant dense<0.000000e+00> : vector<8xf32>
    %62 = vector.multi_reduction <add>, %61, %cst_28 [1] : vector<8x8xf32> to vector<8xf32>
    %63 = vector.shape_cast %62 : vector<8xf32> to vector<8x1xf32>
    %64 = tpu.reciprocal %63 {approx = true} : vector<8x1xf32> -> vector<8x1xf32>
    %65 = arith.truncf %61 : vector<8x8xf32> to vector<8x8xbf16>
    %cst_29 = arith.constant dense<0.000000e+00> : vector<8x8xf32>
    %66 = tpu.matmul %65, %53, %cst_29 {dimension_numbers = #tpu.dot_dimension_numbers<[1], [0], [0], [1], [0, 0, 1, 1], [], []>} : vector<8x8xbf16>, vector<8x8xbf16>, vector<8x8xf32> -> vector<8x8xf32>
    %67 = vector.broadcast %64 : vector<8x1xf32> to vector<8x8xf32>
    %68 = arith.mulf %66, %67 : vector<8x8xf32>
    %69 = arith.truncf %68 : vector<8x8xf32> to vector<8x8xbf16>
    %c8 = arith.constant 8 : index
    %c0_30 = arith.constant 0 : index
    %70 = vector.load %arg9[%c8, %c0_30] : memref<32x32xbf16, #tpu.memory_space<vmem>>, vector<8x32xbf16>
    %cst_31 = arith.constant dense<0.000000e+00> : vector<8x32xf32>
    %71 = tpu.matmul %69, %70, %cst_31 {dimension_numbers = #tpu.dot_dimension_numbers<[1], [0], [0], [1], [0, 0, 1, 1], [], []>} : vector<8x8xbf16>, vector<8x32xbf16>, vector<8x32xf32> -> vector<8x32xf32>
    %72 = arith.addf %47, %71 : vector<8x32xf32>
    %73 = vector.extract_strided_slice %10 {offsets = [0, 16], sizes = [8, 8], strides = [1, 1]} : vector<8x32xf32> to vector<8x8xf32>
    %74 = arith.truncf %73 : vector<8x8xf32> to vector<8x8xbf16>
    %75 = vector.extract_strided_slice %16 {offsets = [0, 16], sizes = [8, 8], strides = [1, 1]} : vector<8x32xf32> to vector<8x8xf32>
    %76 = arith.truncf %75 : vector<8x8xf32> to vector<8x8xbf16>
    %77 = vector.extract_strided_slice %17 {offsets = [0, 16], sizes = [8, 8], strides = [1, 1]} : vector<8x32xf32> to vector<8x8xf32>
    %78 = arith.truncf %77 : vector<8x8xf32> to vector<8x8xbf16>
    %cst_32 = arith.constant dense<0.000000e+00> : vector<8x8xf32>
    %79 = tpu.matmul %74, %76, %cst_32 {dimension_numbers = #tpu.dot_dimension_numbers<[1], [1], [0], [0], [0, 0, 1, 0], [], []>} : vector<8x8xbf16>, vector<8x8xbf16>, vector<8x8xf32> -> vector<8x8xf32>
    %80 = vector.broadcast %21 : vector<1x8xf32> to vector<8x8xf32>
    %81 = arith.addf %79, %80 : vector<8x8xf32>
    %cst_33 = arith.constant dense<0xFF800000> : vector<8xf32>
    %82 = vector.multi_reduction <maximumf>, %81, %cst_33 [1] : vector<8x8xf32> to vector<8xf32>
    %83 = vector.shape_cast %82 : vector<8xf32> to vector<8x1xf32>
    %84 = vector.broadcast %83 : vector<8x1xf32> to vector<8x8xf32>
    %85 = arith.subf %81, %84 : vector<8x8xf32>
    %86 = math.exp %85 : vector<8x8xf32>
    %cst_34 = arith.constant dense<0.000000e+00> : vector<8xf32>
    %87 = vector.multi_reduction <add>, %86, %cst_34 [1] : vector<8x8xf32> to vector<8xf32>
    %88 = vector.shape_cast %87 : vector<8xf32> to vector<8x1xf32>
    %89 = tpu.reciprocal %88 {approx = true} : vector<8x1xf32> -> vector<8x1xf32>
    %90 = arith.truncf %86 : vector<8x8xf32> to vector<8x8xbf16>
    %cst_35 = arith.constant dense<0.000000e+00> : vector<8x8xf32>
    %91 = tpu.matmul %90, %78, %cst_35 {dimension_numbers = #tpu.dot_dimension_numbers<[1], [0], [0], [1], [0, 0, 1, 1], [], []>} : vector<8x8xbf16>, vector<8x8xbf16>, vector<8x8xf32> -> vector<8x8xf32>
    %92 = vector.broadcast %89 : vector<8x1xf32> to vector<8x8xf32>
    %93 = arith.mulf %91, %92 : vector<8x8xf32>
    %94 = arith.truncf %93 : vector<8x8xf32> to vector<8x8xbf16>
    %c16 = arith.constant 16 : index
    %c0_36 = arith.constant 0 : index
    %95 = vector.load %arg9[%c16, %c0_36] : memref<32x32xbf16, #tpu.memory_space<vmem>>, vector<8x32xbf16>
    %cst_37 = arith.constant dense<0.000000e+00> : vector<8x32xf32>
    %96 = tpu.matmul %94, %95, %cst_37 {dimension_numbers = #tpu.dot_dimension_numbers<[1], [0], [0], [1], [0, 0, 1, 1], [], []>} : vector<8x8xbf16>, vector<8x32xbf16>, vector<8x32xf32> -> vector<8x32xf32>
    %97 = arith.addf %72, %96 : vector<8x32xf32>
    %98 = vector.extract_strided_slice %10 {offsets = [0, 24], sizes = [8, 8], strides = [1, 1]} : vector<8x32xf32> to vector<8x8xf32>
    %99 = arith.truncf %98 : vector<8x8xf32> to vector<8x8xbf16>
    %100 = vector.extract_strided_slice %16 {offsets = [0, 24], sizes = [8, 8], strides = [1, 1]} : vector<8x32xf32> to vector<8x8xf32>
    %101 = arith.truncf %100 : vector<8x8xf32> to vector<8x8xbf16>
    %102 = vector.extract_strided_slice %17 {offsets = [0, 24], sizes = [8, 8], strides = [1, 1]} : vector<8x32xf32> to vector<8x8xf32>
    %103 = arith.truncf %102 : vector<8x8xf32> to vector<8x8xbf16>
    %cst_38 = arith.constant dense<0.000000e+00> : vector<8x8xf32>
    %104 = tpu.matmul %99, %101, %cst_38 {dimension_numbers = #tpu.dot_dimension_numbers<[1], [1], [0], [0], [0, 0, 1, 0], [], []>} : vector<8x8xbf16>, vector<8x8xbf16>, vector<8x8xf32> -> vector<8x8xf32>
    %105 = vector.broadcast %21 : vector<1x8xf32> to vector<8x8xf32>
    %106 = arith.addf %104, %105 : vector<8x8xf32>
    %cst_39 = arith.constant dense<0xFF800000> : vector<8xf32>
    %107 = vector.multi_reduction <maximumf>, %106, %cst_39 [1] : vector<8x8xf32> to vector<8xf32>
    %108 = vector.shape_cast %107 : vector<8xf32> to vector<8x1xf32>
    %109 = vector.broadcast %108 : vector<8x1xf32> to vector<8x8xf32>
    %110 = arith.subf %106, %109 : vector<8x8xf32>
    %111 = math.exp %110 : vector<8x8xf32>
    %cst_40 = arith.constant dense<0.000000e+00> : vector<8xf32>
    %112 = vector.multi_reduction <add>, %111, %cst_40 [1] : vector<8x8xf32> to vector<8xf32>
    %113 = vector.shape_cast %112 : vector<8xf32> to vector<8x1xf32>
    %114 = tpu.reciprocal %113 {approx = true} : vector<8x1xf32> -> vector<8x1xf32>
    %115 = arith.truncf %111 : vector<8x8xf32> to vector<8x8xbf16>
    %cst_41 = arith.constant dense<0.000000e+00> : vector<8x8xf32>
    %116 = tpu.matmul %115, %103, %cst_41 {dimension_numbers = #tpu.dot_dimension_numbers<[1], [0], [0], [1], [0, 0, 1, 1], [], []>} : vector<8x8xbf16>, vector<8x8xbf16>, vector<8x8xf32> -> vector<8x8xf32>
    %117 = vector.broadcast %114 : vector<8x1xf32> to vector<8x8xf32>
    %118 = arith.mulf %116, %117 : vector<8x8xf32>
    %119 = arith.truncf %118 : vector<8x8xf32> to vector<8x8xbf16>
    %c24 = arith.constant 24 : index
    %c0_42 = arith.constant 0 : index
    %120 = vector.load %arg9[%c24, %c0_42] : memref<32x32xbf16, #tpu.memory_space<vmem>>, vector<8x32xbf16>
    %cst_43 = arith.constant dense<0.000000e+00> : vector<8x32xf32>
    %121 = tpu.matmul %119, %120, %cst_43 {dimension_numbers = #tpu.dot_dimension_numbers<[1], [0], [0], [1], [0, 0, 1, 1], [], []>} : vector<8x8xbf16>, vector<8x32xbf16>, vector<8x32xf32> -> vector<8x32xf32>
    %122 = arith.addf %97, %121 : vector<8x32xf32>
    %c0_44 = arith.constant 0 : index
    %c0_45 = arith.constant 0 : index
    %123 = vector.load %arg10[%c0_44, %c0_45] : memref<1x32xf32, #tpu.memory_space<vmem>>, vector<1x32xf32>
    %124 = vector.broadcast %123 : vector<1x32xf32> to vector<8x32xf32>
    %125 = arith.addf %122, %124 : vector<8x32xf32>
    %126 = arith.truncf %125 : vector<8x32xf32> to vector<8x32xbf16>
    %c0_46 = arith.constant 0 : index
    %c0_47 = arith.constant 0 : index
    %127 = vector.load %arg11[%c0_46, %c0_47] : memref<32x32xbf16, #tpu.memory_space<vmem>>, vector<32x32xbf16>
    %cst_48 = arith.constant dense<0.000000e+00> : vector<8x32xf32>
    %128 = tpu.matmul %126, %127, %cst_48 {dimension_numbers = #tpu.dot_dimension_numbers<[1], [0], [0], [1], [0, 0, 1, 1], [], []>} : vector<8x32xbf16>, vector<32x32xbf16>, vector<8x32xf32> -> vector<8x32xf32>
    %c0_49 = arith.constant 0 : index
    %c0_50 = arith.constant 0 : index
    %129 = vector.load %arg12[%c0_49, %c0_50] : memref<1x32xf32, #tpu.memory_space<vmem>>, vector<1x32xf32>
    %130 = vector.broadcast %129 : vector<1x32xf32> to vector<8x32xf32>
    %131 = arith.addf %128, %130 : vector<8x32xf32>
    %132 = arith.addf %131, %1 : vector<8x32xf32>
    %cst_51 = arith.constant dense<0.000000e+00> : vector<8xf32>
    %133 = vector.multi_reduction <add>, %132, %cst_51 [1] : vector<8x32xf32> to vector<8xf32>
    %134 = vector.shape_cast %133 : vector<8xf32> to vector<8x1xf32>
    %cst_52 = arith.constant 3.200000e+01 : f32
    %135 = vector.broadcast %cst_52 : f32 to vector<8x1xf32>
    %136 = arith.divf %134, %135 : vector<8x1xf32>
    %137 = vector.broadcast %136 : vector<8x1xf32> to vector<8x32xf32>
    %138 = arith.subf %132, %137 : vector<8x32xf32>
    %139 = arith.mulf %138, %138 : vector<8x32xf32>
    %cst_53 = arith.constant dense<0.000000e+00> : vector<8xf32>
    %140 = vector.multi_reduction <add>, %139, %cst_53 [1] : vector<8x32xf32> to vector<8xf32>
    %141 = vector.shape_cast %140 : vector<8xf32> to vector<8x1xf32>
    %cst_54 = arith.constant 3.200000e+01 : f32
    %142 = vector.broadcast %cst_54 : f32 to vector<8x1xf32>
    %143 = arith.divf %141, %142 : vector<8x1xf32>
    %cst_55 = arith.constant 9.99999996E-13 : f32
    %144 = vector.broadcast %cst_55 : f32 to vector<8x1xf32>
    %145 = arith.addf %143, %144 : vector<8x1xf32>
    %146 = math.rsqrt %145 : vector<8x1xf32>
    %147 = vector.broadcast %146 : vector<8x1xf32> to vector<8x32xf32>
    %148 = arith.mulf %138, %147 : vector<8x32xf32>
    %c0_56 = arith.constant 0 : index
    %c0_57 = arith.constant 0 : index
    %149 = vector.load %arg13[%c0_56, %c0_57] : memref<1x32xf32, #tpu.memory_space<vmem>>, vector<1x32xf32>
    %150 = vector.broadcast %149 : vector<1x32xf32> to vector<8x32xf32>
    %151 = arith.mulf %148, %150 : vector<8x32xf32>
    %c0_58 = arith.constant 0 : index
    %c0_59 = arith.constant 0 : index
    %152 = vector.load %arg14[%c0_58, %c0_59] : memref<1x32xf32, #tpu.memory_space<vmem>>, vector<1x32xf32>
    %153 = vector.broadcast %152 : vector<1x32xf32> to vector<8x32xf32>
    %154 = arith.addf %151, %153 : vector<8x32xf32>
    %155 = arith.addf %125, %154 : vector<8x32xf32>
    %c0_60 = arith.constant 0 : index
    %c0_61 = arith.constant 0 : index
    %c0_62 = arith.constant 0 : index
    %156 = vector.load %arg15[%c0_60, %c0_61, %c0_62] : memref<1x8x32xf32, #tpu.memory_space<vmem>>, vector<1x8x32xf32>
    %157 = vector.shape_cast %156 : vector<1x8x32xf32> to vector<8x32xf32>
    %158 = vector.shape_cast %155 : vector<8x32xf32> to vector<1x8x32xf32>
    tpu.vector_store %arg15[%c0_60, %c0_61, %c0_62], %158 {strides = array<i32>} : memref<1x8x32xf32, #tpu.memory_space<vmem>>, vector<1x8x32xf32>,
    return
  }
  func.func @transform_0(%arg0: i32, %arg1: i32) -> (i32, i32, i32) {
    %c0_i32 = arith.constant 0 : i32
    %c0_i32_0 = arith.constant 0 : i32
    return %arg0, %arg1, %c0_i32 : i32, i32, i32
  }
  func.func @transform_1(%arg0: i32, %arg1: i32) -> (i32, i32, i32) {
    %c0_i32 = arith.constant 0 : i32
    %c0_i32_0 = arith.constant 0 : i32
    %c0_i32_1 = arith.constant 0 : i32
    return %arg0, %c0_i32, %c0_i32_0 : i32, i32, i32
  }
  func.func @transform_2(%arg0: i32, %arg1: i32) -> (i32, i32, i32) {
    %c0_i32 = arith.constant 0 : i32
    %c0_i32_0 = arith.constant 0 : i32
    %c0_i32_1 = arith.constant 0 : i32
    return %arg0, %c0_i32, %c0_i32_0 : i32, i32, i32
  }
  func.func @transform_3(%arg0: i32, %arg1: i32) -> (i32, i32) {
    %c0_i32 = arith.constant 0 : i32
    %c0_i32_0 = arith.constant 0 : i32
    %c0_i32_1 = arith.constant 0 : i32
    return %c0_i32, %c0_i32_0 : i32, i32
  }
  func.func @transform_4(%arg0: i32, %arg1: i32) -> (i32, i32) {
    %c0_i32 = arith.constant 0 : i32
    %c0_i32_0 = arith.constant 0 : i32
    %c0_i32_1 = arith.constant 0 : i32
    return %c0_i32, %c0_i32_0 : i32, i32
  }
  func.func @transform_5(%arg0: i32, %arg1: i32) -> (i32, i32) {
    %c0_i32 = arith.constant 0 : i32
    %c0_i32_0 = arith.constant 0 : i32
    %c0_i32_1 = arith.constant 0 : i32
    return %c0_i32, %c0_i32_0 : i32, i32
  }
  func.func @transform_6(%arg0: i32, %arg1: i32) -> (i32, i32) {
    %c0_i32 = arith.constant 0 : i32
    %c0_i32_0 = arith.constant 0 : i32
    %c0_i32_1 = arith.constant 0 : i32
    return %c0_i32, %c0_i32_0 : i32, i32
  }
  func.func @transform_7(%arg0: i32, %arg1: i32) -> (i32, i32) {
    %c0_i32 = arith.constant 0 : i32
    %c0_i32_0 = arith.constant 0 : i32
    %c0_i32_1 = arith.constant 0 : i32
    return %c0_i32, %c0_i32_0 : i32, i32
  }
  func.func @transform_8(%arg0: i32, %arg1: i32) -> (i32, i32) {
    %c0_i32 = arith.constant 0 : i32
    %c0_i32_0 = arith.constant 0 : i32
    %c0_i32_1 = arith.constant 0 : i32
    return %c0_i32, %c0_i32_0 : i32, i32
  }
  func.func @transform_9(%arg0: i32, %arg1: i32) -> (i32, i32) {
    %c0_i32 = arith.constant 0 : i32
    %c0_i32_0 = arith.constant 0 : i32
    %c0_i32_1 = arith.constant 0 : i32
    return %c0_i32, %c0_i32_0 : i32, i32
  }
  func.func @transform_10(%arg0: i32, %arg1: i32) -> (i32, i32) {
    %c0_i32 = arith.constant 0 : i32
    %c0_i32_0 = arith.constant 0 : i32
    %c0_i32_1 = arith.constant 0 : i32
    return %c0_i32, %c0_i32_0 : i32, i32
  }
  func.func @transform_11(%arg0: i32, %arg1: i32) -> (i32, i32) {
    %c0_i32 = arith.constant 0 : i32
    %c0_i32_0 = arith.constant 0 : i32
    %c0_i32_1 = arith.constant 0 : i32
    return %c0_i32, %c0_i32_0 : i32, i32
  }
  func.func @transform_12(%arg0: i32, %arg1: i32) -> (i32, i32) {
    %c0_i32 = arith.constant 0 : i32
    %c0_i32_0 = arith.constant 0 : i32
    %c0_i32_1 = arith.constant 0 : i32
    return %c0_i32, %c0_i32_0 : i32, i32
  }
  func.func @transform_13(%arg0: i32, %arg1: i32) -> (i32, i32, i32) {
    %c0_i32 = arith.constant 0 : i32
    %c0_i32_0 = arith.constant 0 : i32
    return %arg0, %arg1, %c0_i32 : i32, i32, i32
  }
}

</mosaic_0001>

<bundles_post_ra>
// kernel: tpu_custom_call.1
= control target key start
LH: loop header
LB: loop body
LE: loop exit
PB: predicated region body
PF: predicated region fallthrough
CT: control target
= control target key end

     0   :  { %s2877_s0 = inlined_call_operand.hbm [shape: f32[2,8,32], index: 0, kind: input, shape index: {}]   ;;  %s2878_s1 = inlined_call_operand.hbm [shape: f32[2,8,32], index: 1, kind: input, shape index: {}]   ;;  %s2879_s2 = inlined_call_operand.vmem [shape: f32[2,1,8], index: 2, kind: input, shape index: {}]   ;;  %s2880_s3 = inlined_call_operand.hbm [shape: bf16[32,32], index: 3, kind: input, shape index: {}]   ;;  %s2881_s4 = inlined_call_operand.hbm [shape: f32[1,32], index: 4, kind: input, shape index: {}]   ;;  %s2882_s5 = inlined_call_operand.vmem [shape: bf16[32,64], index: 5, kind: input, shape index: {}]   ;;  %s2883_s6 = inlined_call_operand.hbm [shape: f32[1,64], index: 6, kind: input, shape index: {}]   ;;  %s2884_s7 = inlined_call_operand.hbm [shape: bf16[32,32], index: 7, kind: input, shape index: {}]   ;;  %s2885_s8 = inlined_call_operand.hbm [shape: f32[1,32], index: 8, kind: input, shape index: {}]   ;;  %s2886_s9 = inlined_call_operand.vmem [shape: bf16[32,32], index: 9, kind: input, shape index: {}]   ;;  %s2887_s10 = inlined_call_operand.vmem [shape: f32[1,32], index: 10, kind: input, shape index: {}]   ;;  %s2888_s11 = inlined_call_operand.vmem [shape: f32[1,32], index: 11, kind: input, shape index: {}]   ;;  %s2889_s12 = inlined_call_operand.vmem [shape: f32[1,32], index: 12, kind: input, shape index: {}]   ;;  %s2890_s13 = inlined_call_operand.hbm [shape: f32[2,8,32], index: 13, kind: output, shape index: {}]  }
   0x1   :  { %2898 = sst [smem:[#allocation22_spill]] %s2879_s2 }
   0x2   :  { %2899 = sst [smem:[#allocation23_spill]] %s2880_s3 }
   0x3   :  { %2900 = sst [smem:[#allocation24_spill]] %s2881_s4 }
   0x4   :  { %2901 = sst [smem:[#allocation25_spill]] %s2883_s6 }
   0x5   :  { %2902 = sst [smem:[#allocation26_spill]] %s2884_s7 }
   0x6   :  { %2903 = sst [smem:[#allocation27_spill]] %s2885_s8 }
   0x7   :  { %2904 = sst [smem:[#allocation28_spill]] %s2886_s9 }
   0x8   :  { %2905 = sst [smem:[#allocation29_spill]] %s2887_s10 }
   0x9   :  { %2906 = sst [smem:[#allocation30_spill]] %s2888_s11 }
   0xa   :  { %2907 = sst [smem:[#allocation31_spill]] %s2889_s12 }
   0xb   :  { %2908 = sst [smem:[#allocation32_spill]] %s2890_s13 }
   0xc   :  { %18 = vsyncpa [#allocation3], 0 }
   0xd   :  { %20 = vsyncpa [#allocation3 + $0x1], 0 }
   0xe   :  { %21 = vsyncpa [#allocation6], 0 }
   0xf   :  { %23 = vsyncpa [#allocation6 + $0x1], 0 }
  0x10   :  { %24 = vsyncpa [#allocation9], 0 }
  0x11   :  { %25 = vsyncpa [#allocation12], 0 }
  0x12   :  { %26 = vsyncpa [#allocation4], 0 }
  0x13   :  { %28 = vsyncpa [#allocation4 + $0x1], 0  ;;  %s2378_s25 = smov 0   ;;  %s2380_s26 = smov 0  }
  0x14   :  { %s2382_s27 = smov 0   ;;  %s2384_s28 = smov 0  }
  0x15   :  { %s2386_s29 = smov 0   ;;  %s2388_s30 = smov 0  }
  0x16 LB: > { %2909 = sst [smem:[#allocation21_spill]] %s2279_s28  ;;  %s2409_s14 = sadd.s32 4294967295, %s2287_s30   ;;  %s2287_s30 = sphi %s2388_s30, %s34_s30   ;;  %s2283_s29 = sphi %s2386_s29, %s2946_s29   ;;  %s2279_s28 = sphi %s2384_s28, %s2945_s28   ;;  %s2275_s27 = sphi %s2382_s27, %s2944_s27   ;;  %s2271_s26 = sphi %s2380_s26, %s2943_s26   ;;  %s2267_s25 = sphi %s2378_s25, %s2942_s25  }
  0x17   : > { %p1656_p0 = scmp.ge.s32.totalorder %s2287_s30, 1  ;;  %p2894_p1 = scmp.eq.s32.totalorder %s2409_s14, 0 }
  0x18   : > { %p369_p2 = scmp.lt.s32.totalorder %s2287_s30, 3  ;;  %s2289_s16 = smov [#allocation7]  }
  0x19   : > { %s381_s17 = sshll.u32 %s2289_s16, 4  ;;  %s2290_s19 = smov [#allocation8]   ;;  %s2418_s17 = int_to_ptr.vmem [resolvable:$true] %s381_s17 }
  0x1a   : > { %p2414_p3 = pnand %p1656_p0, %p369_p2  ;;  %s395_s20 = sshll.u32 %s2290_s19, 4  ;;  %s2429_s20 = int_to_ptr.vmem [resolvable:$true] %s395_s20 }
  0x1b   : > { %s2291_s21 = smov [#allocation11]   ;;  %s2912_s3 = sld [smem:[#allocation23_spill]] }
  0x1c   : > { %s2910_s15 = scalar_select %p2414_p3, 1, 0 }
  0x1d   : > { %p1862_p4 = pneg %p2414_p3  ;;  %s2431_s22 = sshll.u32 %s2291_s21, 4  ;;  %s420_s22 = int_to_ptr.vmem [resolvable:$true] %s2431_s22 }
  0x1f   : > { %p2425_p6 = pnand %p1862_p4, %p2894_p1 }
  0x21   : > { %s1989_s16 = scalar_lea.hbm %s2912_s3, 256  ;;  %p2441_p8 = pneg %p2425_p6 }
  0x22   : > { %p1990_p7 = scmp.ne.s32.totalorder %s2912_s3, %s1989_s16  ;;  %p1996_p11 = scmp.lt.u32.totalorder %s1989_s16, %s2912_s3 }
  0x24   : > { %p1992_p9 = pnand %p2441_p8, %p1990_p7 }
  0x26   : > { %p1993_p10 = pneg %p1992_p9 }
  0x28   : > { %p1998_p12 = pnand %p1996_p11, %p1993_p10 }
  0x2a   : > { %2001 = shalt.err (!%p1998_p12)
}
  0x2b   : > { %s2002_s12 = scalar_lea.vmem %s2418_s17, 256  ;;  %p2010_p4 = scmp.lt.s32.totalorder %s2418_s17, %s2418_s17 }
  0x2c   : > { %p2003_p13 = scmp.ne.s32.totalorder %s2418_s17, %s2002_s12  ;;  %p2011_p5 = scmp.lt.s32.totalorder %s2002_s12, %s2002_s12 }
  0x2e   : > { %p2005_p0 = pnand %p2003_p13, %p2441_p8  ;;  %p2012_p7 = por %p2011_p5, %p2010_p4 }
  0x30   : > { %p2006_p2 = pneg %p2005_p0 }
  0x32   : > { %p2013_p9 = pnand %p2012_p7, %p2006_p2 }
  0x34   : > { %2016 = shalt.err (!%p2013_p9)
}
  0x35   : > { %s2292_s13 = smov 64   ;;  %s2293_s23 = smov 4  }
  0x36   : > { %1865 = dma.hbm_to_vmem [thread:$0]  (!%p2425_p6), %s2912_s3, 256, %s2418_s17, [#allocation6], %s2292_s13, %s2292_s13, %s2293_s23  }
  0x37   : > { %s2914_s4 = sld [smem:[#allocation24_spill]] }
  0x3d   : > { %s2017_s12 = scalar_lea.hbm %s2914_s4, 16 }
  0x3e   : > { %p2018_p5 = scmp.ne.s32.totalorder %s2914_s4, %s2017_s12  ;;  %p2024_p12 = scmp.lt.u32.totalorder %s2017_s12, %s2914_s4 }
  0x40   : > { %p2020_p10 = pnand %p2018_p5, %p2441_p8 }
  0x42   : > { %p2021_p11 = pneg %p2020_p10 }
  0x44   : > { %p2026_p13 = pnand %p2024_p12, %p2021_p11 }
  0x46   : > { %2029 = shalt.err (!%p2026_p13)
}
  0x47   : > { %s2030_s17 = scalar_lea.vmem %s2429_s20, 16  ;;  %s2037_s9 = scalar_lea.vmem %s2429_s20, 32 }
  0x48   : > { %p2031_p0 = scmp.ne.s32.totalorder %s2429_s20, %s2030_s17  ;;  %p2038_p7 = scmp.lt.s32.totalorder %s2429_s20, %s2429_s20 }
  0x49   : > { %p2039_p9 = scmp.lt.s32.totalorder %s2037_s9, %s2030_s17 }
  0x4a   : > { %p2033_p2 = pnand %p2031_p0, %p2441_p8 }
  0x4b   : > { %p2040_p5 = por %p2039_p9, %p2038_p7 }
  0x4c   : > { %p2034_p4 = pneg %p2033_p2 }
  0x4e   : > { %p2041_p10 = pnand %p2040_p5, %p2034_p4 }
  0x50   : > { %2044 = shalt.err (!%p2041_p10)
}
  0x51   : > { %1868 = dma.hbm_to_vmem [thread:$0]  (!%p2425_p6), %s2914_s4, 16, %s2429_s20, [#allocation9]  }
  0x52   : > { %s2915_s7 = sld [smem:[#allocation26_spill]] }
  0x58   : > { %s2045_s16 = scalar_lea.hbm %s2915_s7, 256 }
  0x59   : > { %p2046_p11 = scmp.ne.s32.totalorder %s2915_s7, %s2045_s16  ;;  %p2052_p0 = scmp.lt.u32.totalorder %s2045_s16, %s2915_s7 }
  0x5b   : > { %p2048_p12 = pnand %p2046_p11, %p2441_p8 }
  0x5d   : > { %p2049_p13 = pneg %p2048_p12 }
  0x5f   : > { %p2054_p2 = pnand %p2052_p0, %p2049_p13 }
  0x61   : > { %2057 = shalt.err (!%p2054_p2)
}
  0x62   : > { %s2058_s9 = scalar_lea.vmem %s420_s22, 256  ;;  %p2066_p5 = scmp.lt.s32.totalorder %s420_s22, %s420_s22 }
  0x63   : > { %p2059_p4 = scmp.ne.s32.totalorder %s420_s22, %s2058_s9  ;;  %p2067_p10 = scmp.lt.s32.totalorder %s2058_s9, %s2058_s9 }
  0x65   : > { %p2061_p7 = pnand %p2059_p4, %p2441_p8  ;;  %p2068_p1 = por %p2067_p10, %p2066_p5 }
  0x67   : > { %p2062_p9 = pneg %p2061_p7 }
  0x69   : > { %p2069_p3 = pnand %p2068_p1, %p2062_p9 }
  0x6b   : > { %2072 = shalt.err (!%p2069_p3)
}
  0x6c   : > { %1874 = dma.hbm_to_vmem [thread:$0]  (!%p2425_p6), %s2915_s7, 256, %s420_s22, [#allocation12], %s2292_s13, %s2292_s13, %s2293_s23  }
  0x6d   : > { %s2294_s10 = smov [#allocation10]   ;;  %s2295_s24 = smov [#allocation13]  }
  0x6e   : > { %s409_s28 = sshll.u32 %s2294_s10, 4  ;;  %s433_s16 = sshll.u32 %s2295_s24, 4  ;;  %s410_s28 = int_to_ptr.vmem [resolvable:$true] %s409_s28  ;;  %s434_s16 = int_to_ptr.vmem [resolvable:$true] %s433_s16 }
  0x6f   : > { %s2916_s6 = sld [smem:[#allocation25_spill]] }
  0x75   : > { %s2073_s12 = scalar_lea.hbm %s2916_s6, 16 }
  0x76   : > { %p2074_p1 = scmp.ne.s32.totalorder %s2916_s6, %s2073_s12  ;;  %p2080_p12 = scmp.lt.u32.totalorder %s2073_s12, %s2916_s6 }
  0x78   : > { %p2076_p3 = pnand %p2074_p1, %p2441_p8 }
  0x7a   : > { %p2077_p11 = pneg %p2076_p3 }
  0x7c   : > { %p2082_p13 = pnand %p2080_p12, %p2077_p11 }
  0x7e   : > { %2085 = shalt.err (!%p2082_p13)
}
  0x7f   : > { %s2086_s22 = scalar_lea.vmem %s410_s28, 16  ;;  %s2093_s13 = scalar_lea.vmem %s410_s28, 32 }
  0x80   : > { %p2087_p0 = scmp.ne.s32.totalorder %s410_s28, %s2086_s22  ;;  %p2094_p7 = scmp.lt.s32.totalorder %s410_s28, %s410_s28 }
  0x81   : > { %p2095_p9 = scmp.lt.s32.totalorder %s2093_s13, %s2086_s22 }
  0x82   : > { %p2089_p2 = pnand %p2087_p0, %p2441_p8 }
  0x83   : > { %p2096_p5 = por %p2095_p9, %p2094_p7 }
  0x84   : > { %p2090_p4 = pneg %p2089_p2 }
  0x86   : > { %p2097_p10 = pnand %p2096_p5, %p2090_p4 }
  0x88   : > { %2100 = shalt.err (!%p2097_p10)
}
  0x89   : > { %1871 = dma.hbm_to_vmem [thread:$0]  (!%p2425_p6), %s2916_s6, 16, %s410_s28, [#allocation9]  }
  0x8a   : > { %s2917_s8 = sld [smem:[#allocation27_spill]] }
  0x90   : > { %s2101_s24 = scalar_lea.hbm %s2917_s8, 16 }
  0x91   : > { %p2102_p1 = scmp.ne.s32.totalorder %s2917_s8, %s2101_s24  ;;  %p2108_p12 = scmp.lt.u32.totalorder %s2101_s24, %s2917_s8 }
  0x93   : > { %p2104_p3 = pnand %p2102_p1, %p2441_p8 }
  0x95   : > { %p2105_p11 = pneg %p2104_p3 }
  0x97   : > { %p2110_p13 = pnand %p2108_p12, %p2105_p11 }
  0x99   : > { %2113 = shalt.err (!%p2110_p13)
}
  0x9a   : > { %s2114_s9 = scalar_lea.vmem %s434_s16, 16  ;;  %s2121_s28 = scalar_lea.vmem %s434_s16, 32 }
  0x9b   : > { %p2115_p0 = scmp.ne.s32.totalorder %s434_s16, %s2114_s9  ;;  %p2122_p7 = scmp.lt.s32.totalorder %s434_s16, %s434_s16 }
  0x9c   : > { %p2123_p9 = scmp.lt.s32.totalorder %s2121_s28, %s2114_s9 }
  0x9d   : > { %p2117_p2 = pnand %p2115_p0, %p2441_p8 }
  0x9e   : > { %p2124_p5 = por %p2123_p9, %p2122_p7 }
  0x9f   : > { %p2118_p4 = pneg %p2117_p2 }
  0xa1   : > { %p2125_p10 = pnand %p2124_p5, %p2118_p4 }
  0xa3   : > { %2128 = shalt.err (!%p2125_p10)
}
  0xa4   : > { %1877 = dma.hbm_to_vmem [thread:$0]  (!%p2425_p6), %s2917_s8, 16, %s434_s16, [#allocation12]  }
  0xa5   : > { %s1655_s11 = sadd.s32 4294967294, %s2287_s30   ;;  %s46_s13 = sadd.s32 1, %s2283_s29 }
  0xa6   : > { %s55_s18 = sadd.s32 1, %s2275_s27  ;;  %p48_p8 = scmp.ge.s32.totalorder %s46_s13, 2 }
  0xa7   : > { %p62_p1 = scmp.ne.s32.totalorder %s2275_s27, %s2271_s26  ;;  %p63_p3 = scmp.eq.s32.totalorder %s2287_s30, 0 }
  0xa8   : > { %p68_p11 = scmp.ne.s32.totalorder %s2271_s26, %s2267_s25  ;;  %s2948_s13 = smov (%p48_p8, %s46_s13), 0 }
  0xa9   : > { %p2557_p12 = por %p63_p3, %p62_p1  ;;  %p2919_p13 = scmp.eq.s32.totalorder %s2409_s14, 0 }
  0xaa   : > { %s50_s2 = ssub.s32 %s2283_s29, %s2948_s13  ;;  %p356_p0 = scmp.eq.s32.totalorder %s2409_s14, 1 }
  0xab   : > { %p2563_p6 = por %p2919_p13, %p68_p11  ;;  %p53_p2 = scmp.eq.s32.totalorder %s50_s2, 0 }
  0xac   : > { %p362_p4 = scmp.eq.s32.totalorder %s1655_s11, 1  ;;  %p2570_p7 = por %p356_p0, %p62_p1 }
  0xad   : > { %s2920_s16 = scalar_select %p2563_p6, 1, 0 }
  0xae   : > { %s2921_s3 = scalar_select %p2570_p7, 1, 0 }
  0xaf   : > { %p1894_p9 = scmp.lt.s32.totalorder %s2287_s30, 2  ;;  %p2578_p5 = por %p362_p4, %p68_p11 }
  0xb0   : > { %s2576_s10 = scalar_select %p53_p2, %s2275_s27, %s55_s18  }
  0xb1   : > { %s2922_s24 = scalar_select %p2578_p5, 1, 0 }
  0xb2   : > { %s456_s19 = sand.u32 1, %s2275_s27   ;;  %s1664_s12 = sshll.u32 %s2283_s29, 7 }
  0xb3   : > { %s2583_s21 = sshll.u32 %s456_s19, 3  ;;  %s2589_s28 = scalar_lea.hbm %s2877_s0, %s1664_s12 }
  0xb4   : > { %s460_s20 = scalar_lea.vmem [#allocation2], %s2583_s21  ;;  %p2596_p10 = pnand %p1894_p9, %p2557_p12 }
  0xb5   : > { %s468_s22 = sshll.u32 %s460_s20, 4  ;;  %s2603_s17 = scalar_lea.hbm %s2878_s1, %s1664_s12  ;;  %s2592_s22 = int_to_ptr.vmem [resolvable:$true] %s468_s22 }
  0xb6   : > { %s475_s9 = sand.u32 1, %s2287_s30   ;;  %s457_s4 = scalar_lea.sflag [#allocation3], %s456_s19 }
  0xb7   : > { %s2129_s6 = scalar_lea.hbm %s2589_s28, 128  ;;  %p2131_p1 = pneg %p2596_p10 }
  0xb8   : > { %p2130_p8 = scmp.ne.s32.totalorder %s2589_s28, %s2129_s6  ;;  %s2134_s7 = scalar_lea.hbm %s2877_s0, 256 }
  0xb9   : > { %p2135_p12 = scmp.lt.u32.totalorder %s2589_s28, %s2877_s0  ;;  %p2136_p13 = scmp.lt.u32.totalorder %s2134_s7, %s2129_s6 }
  0xba   : > { %p2132_p3 = pnand %p2131_p1, %p2130_p8  ;;  %p2138_p2 = scmp.lt.u32.totalorder %s2129_s6, %s2589_s28 }
  0xbb   : > { %p2137_p0 = por %p2136_p13, %p2135_p12 }
  0xbc   : > { %p2133_p11 = pneg %p2132_p3 }
  0xbd   : > { %p2139_p4 = por %p2138_p2, %p2137_p0 }
  0xbf   : > { %p2140_p9 = pnand %p2139_p4, %p2133_p11 }
  0xc1   : > { %2143 = shalt.err (!%p2140_p9)
}
  0xc2   : > { %s2144_s19 = scalar_lea.vmem %s2592_s22, 128  ;;  %s2296_s12 = smov [#allocation2]  }
  0xc3   : > { %p2145_p8 = scmp.ne.s32.totalorder %s2592_s22, %s2144_s19  ;;  %s2149_s2 = sshll.u32 %s2296_s12, 4  ;;  %s2150_s2 = int_to_ptr.vmem [resolvable:$false] %s2149_s2 }
  0xc4   : > { %s2151_s8 = scalar_lea.vmem %s2150_s2, 256  ;;  %p2152_p7 = scmp.lt.s32.totalorder %s2592_s22, %s2150_s2 }
  0xc5   : > { %p2147_p3 = pnand %p2145_p8, %p2131_p1  ;;  %p2153_p12 = scmp.lt.s32.totalorder %s2151_s8, %s2144_s19 }
  0xc7   : > { %p2148_p5 = pneg %p2147_p3  ;;  %p2154_p13 = por %p2153_p12, %p2152_p7 }
  0xc9   : > { %p2155_p0 = pnand %p2154_p13, %p2148_p5 }
  0xcb   : > { %2158 = shalt.err (!%p2155_p0)
}
  0xcc   : > { %1881 = dma.hbm_to_vmem [thread:$0]  (!%p2596_p10), %s2589_s28, 128, %s2592_s22, %s457_s4  }
  0xcd   : > { %s479_s6 = scalar_lea.vmem [#allocation5], %s2583_s21  ;;  %s476_s23 = scalar_lea.sflag [#allocation6], %s475_s9 }
  0xce   : > { %s486_s7 = sshll.u32 %s479_s6, 4  ;;  %s2159_s20 = scalar_lea.hbm %s2603_s17, 128  ;;  %s487_s7 = int_to_ptr.vmem [resolvable:$true] %s486_s7 }
  0xcf   : > { %p2160_p7 = scmp.ne.s32.totalorder %s2603_s17, %s2159_s20  ;;  %s2164_s12 = scalar_lea.hbm %s2878_s1, 256 }
  0xd0   : > { %p2165_p2 = scmp.lt.u32.totalorder %s2603_s17, %s2878_s1  ;;  %p2166_p4 = scmp.lt.u32.totalorder %s2164_s12, %s2159_s20 }
  0xd1   : > { %p2162_p5 = pnand %p2160_p7, %p2131_p1  ;;  %p2168_p8 = scmp.lt.u32.totalorder %s2159_s20, %s2603_s17 }
  0xd2   : > { %p2167_p9 = por %p2166_p4, %p2165_p2 }
  0xd3   : > { %p2163_p11 = pneg %p2162_p5 }
  0xd4   : > { %p2169_p3 = por %p2168_p8, %p2167_p9 }
  0xd6   : > { %p2170_p12 = pnand %p2169_p3, %p2163_p11 }
  0xd8   : > { %2173 = shalt.err (!%p2170_p12)
}
  0xd9   : > { %s2174_s4 = scalar_lea.vmem %s487_s7, 128  ;;  %s2297_s21 = smov [#allocation5]  }
  0xda   : > { %p2175_p13 = scmp.ne.s32.totalorder %s487_s7, %s2174_s4  ;;  %s2179_s28 = sshll.u32 %s2297_s21, 4  ;;  %s2180_s28 = int_to_ptr.vmem [resolvable:$false] %s2179_s28 }
  0xdb   : > { %s2181_s22 = scalar_lea.vmem %s2180_s28, 256  ;;  %p2182_p5 = scmp.lt.s32.totalorder %s487_s7, %s2180_s28 }
  0xdc   : > { %p2177_p0 = pnand %p2175_p13, %p2131_p1  ;;  %p2183_p6 = scmp.lt.s32.totalorder %s2181_s22, %s2174_s4 }
  0xde   : > { %p2178_p7 = pneg %p2177_p0  ;;  %p2184_p2 = por %p2183_p6, %p2182_p5 }
  0xe0   : > { %p2185_p4 = pnand %p2184_p2, %p2178_p7 }
  0xe2   : > { %2188 = shalt.err (!%p2185_p4)
}
  0xe3   : > { %1884 = dma.hbm_to_vmem [thread:$0]  (!%p2596_p10), %s2603_s17, 128, %s487_s7, %s476_s23  }
  0xe4   : > { %p2924_p11 = scmp.ne.s32.totalorder %s2910_s15, 0 }
  0xe5   : > { %s2656_s9 = sand.u32 (!%p2924_p11), 1, %s2271_s26   ;;  %p2925_p6 = scmp.ne.s32.totalorder (!%p2924_p11), %s2920_s16, 0 }
  0xe6   : > { %501 = sbr.rel (%p2924_p11) target bundleno = 2933 (0xb75), region = 72  ;;  %s2659_s6 = sshll.u32 (!%p2924_p11), %s2656_s9, 3 }
  0xe7   : > { %s504_s20 = scalar_lea.sflag (!%p2924_p11), [#allocation3], %s2656_s9  ;;  %s507_s18 = scalar_lea.vmem (!%p2924_p11), [#allocation2], %s2659_s6 }
  0xed   : > { %2242 = dma.done.wait (%p2925_p6), %s504_s20, 128  }
  0xee   : > { %2244 = vsyncadd (%p2925_p6), %s504_s20, 4294967168  ;;  %s512_s15 = sand.u32 1, %s2409_s14   ;;  %s516_s17 = scalar_lea.vmem [#allocation5], %s2659_s6 }
  0xef   : > { %s513_s11 = scalar_lea.sflag [#allocation6], %s512_s15 }
  0xf0   : > { %2246 = dma.done.wait (%p2925_p6), %s513_s11, 128  }
  0xf1   : > { %2248 = vsyncadd (%p2925_p6), %s513_s11, 4294967168  ;;  %p2926_p10 = scmp.eq.s32.totalorder %s2409_s14, 0 }
  0xf3   : > { %2250 = dma.done.wait (%p2926_p10), [#allocation6], 256   ;;  %p2927_p1 = pmov %p2926_p10 }
  0xf5   : > { %2252 = vsyncadd (%p2927_p1), [#allocation6], 4294967040  ;;  %p2928_p9 = pmov %p2927_p1 }
  0xf6   : > { %p2929_p8 = pmov %p2927_p1 }
  0xf7   : > { %2254 = dma.done.wait (%p2928_p9), [#allocation9], 32  }
  0xf8   : > { %2256 = vsyncadd (%p2929_p8), [#allocation9], 4294967264  ;;  %p2930_p3 = pmov %p2927_p1 }
  0xf9   : > { %p2931_p12 = pmov %p2927_p1 }
  0xfa   : > { %2258 = dma.done.wait (%p2930_p3), [#allocation12], 272  }
  0xfb   : > { %2260 = vsyncadd (%p2931_p12), [#allocation12], 4294967024  ;;  %v2298_v0 = vmov 0.0   ;;  %vm2299_vm0 = vmmov 0   ;;  %v1965_v1 = vld [vmem:[%s2882_s5] sm:$0xff]   ;;  %v1967_v3 = vld [vmem:[%s2882_s5 + $0x8] sm:$0xff]   ;;  %v733_v29 = vlaneseq }
  0xfc   : > { %1748 = vmatprep.subr.bf16.mxu1 %v2298_v0  ;;  %1740 = vmatprep.subr.bf16.mxu0 %v2298_v0  ;;  %v1966_v2 = vld [vmem:[#allocation7] sm:$0xff]   ;;  %v593_v4 = vld [vmem:[%s516_s17] sm:$0xff]  ;;  %v1968_v5 = vld [vmem:[#allocation7 + $0x8] sm:$0xff]   ;;  %vm618_vm1 = vcmask 261120   ;;  %vm738_vm2 = vcmask 64512   ;;  %s2300_s19 = smov 120  }
  0xfd   : > { %1752 = vmatprep.mubr.msk.bf16.mxu1 %vm2299_vm0, %v2298_v0  ;;  %1744 = vmatprep.mubr.msk.bf16.mxu0 %vm2299_vm0, %v2298_v0  ;;  %v2699_v6 = vld [vmem:[%s507_s18] sm:$0xff]  ;;  %v594_v7 = vpack.c.bf16 %v593_v4, %v593_v4  ;;  %v1680_v9 = vld [vmem:[#allocation10] ss:$0 sm:$0xff]  ;;  %v1676_v10 = vld [vmem:[#allocation8] ss:$0 sm:$0xff]  ;;  %s2301_s12 = smov 96  }
  0xfe   : > { %1749 = vmatpush3.bf16.msra.mxu1 %v1965_v1  ;;  %1741 = vmatpush3.bf16.msra.mxu0 %v1966_v2  ;;  %v592_v8 = vpack.c.bf16 %v2699_v6, %v2699_v6  ;;  %s2932_s2 = sld [smem:[#allocation21_spill]]  ;;  %vm802_vm3 = vcmask 1043456   ;;  %s2933_s28 = sld [smem:[#allocation22_spill]]  ;;  %v734_v30 = vshrl.u32 %v733_v29, 7  ;;  %v848_v58 = vld [vmem:[#allocation11] sm:$0xf] }
  0xff   : > { %1750 = vmatprep.subr.bf16.mxu1 %v2298_v0  ;;  %1742 = vmatprep.subr.bf16.mxu0 %v2298_v0  ;;  %s2302_s20 = smov 88   ;;  %s2303_s18 = smov 112   ;;  %v1012_v62 = vsel %vm802_vm3, %v848_v58, 0  ;;  %v961_v63 = vld [vmem:[#allocation11 + $0x4] sm:$0xf] }
 0x100   : > { %v735_v33 = vsub.s32 0, %v734_v30  ;;  %s2304_s15 = smov 104   ;;  %v966_v1 = vsel %vm802_vm3, %v961_v63, 0  ;;  %s2305_s11 = smov 80  }
 0x101   : > { %s2306_s17 = smov 72   ;;  %s2934_s14 = sld [smem:[#allocation28_spill]] }
 0x102   : > { %1751 = vmatpush3.bf16.msra.mxu1 %v1967_v3  ;;  %1743 = vmatpush3.bf16.msra.mxu0 %v1968_v5  ;;  %s2935_s4 = sld [smem:[#allocation29_spill]]  ;;  %p2939_p7 = scmp.ne.s32.totalorder %s2921_s3, 0 }
 0x103   : > { %1762 = vmatprep.subr.bf16.mxu1 %v2298_v0  ;;  %1756 = vmatprep.subr.bf16.mxu0 %v2298_v0 }
 0x104   : > { %p587_p13 = scmp.lt.s32.totalorder %s2932_s2, 1 }
 0x105   : > { %1753 = vmatmul.mubr.msk.bf16.vlgmr.msra.gmra.mrb[0].mxu1 %vm618_vm1, %v594_v7  ;;  %1745 = vmatmul.mubr.msk.bf16.vlgmr.msra.gmra.mrb[0].mxu0 %vm618_vm1, %v592_v8 }
 0x106   : > { %1764 = vmatprep.mubr.msk.bf16.mxu1 %vm2299_vm0, %v2298_v0  ;;  %1758 = vmatprep.mubr.msk.bf16.mxu0 %vm2299_vm0, %v2298_v0  ;;  %s588_s8 = scalar_select %p587_p13, %s2932_s2, 1 }
 0x108   : > { %s589_s22 = scalar_lea.vmem %s2933_s28, %s588_s8  ;;  %s1481_s8 = scalar_lea.sflag [#allocation4], %s2656_s9 }
 0x109   : > { %v728_v31 = vld [vmem:[%s589_s22] sm:$0x1]  ;;  %s2936_s22 = sld [smem:[#allocation30_spill]] }
 0x10a   : > { %v729_v32 = vmul.f32 -1e+30, %v728_v31 }
 0x10c   : > { %v2733_v34 = vrot.slane %v729_v32, %v735_v33 }
 0x1d8   : > { %v722_v11 = vpop.f32.mrb[0].mxu1  ;;  %v656_v14 = vpop.f32.mrb[0].mxu0 }
 0x1d9   : > { %v723_v12 = vadd.f32 %v1680_v9, %v722_v11  ;;  %v1754_v13 = vpop.f32.mrb[1].mxu1  ;;  %v657_v16 = vadd.f32 %v1676_v10, %v656_v14  ;;  %v1746_v17 = vpop.f32.mrb[1].mxu0 }
 0x1da   : > { %v725_v15 = vpop.f32.mrb[2].mxu1  ;;  %v659_v20 = vpop.f32.mrb[2].mxu0 }
 0x1db   : > { %v2711_v18 = vpack.c.bf16 %v723_v12, %v723_v12  ;;  %v1755_v19 = vpop.f32.mrb[3].mxu1  ;;  %v1747_v21 = vpop.f32.mrb[3].mxu0  ;;  %v730_v22 = vpack.c.bf16 %v657_v16, %v657_v16 }
 0x1dd   : > { %852 = vrot.lane.b32.xlu0 %v2711_v18, %s2300_s19  ;;  %v743_v23 = vsel %vm738_vm2, %v2711_v18, 0 }
 0x1de   : > { %1757 = vmatpush3.bf16.xpose.msra.mxu0 %v743_v23 }
 0x1df   : > { %1768 = vmatprep.subr.bf16.mxu0 %v2298_v0 }
 0x1e1   : > { %850 = vrot.lane.b32.xlu0 %v730_v22, %s2300_s19  ;;  %s2938_s19 = sld [smem:[#allocation32_spill]] }
 0x1e5   : > { %797 = vrot.lane.b32.xlu0 %v2711_v18, %s2301_s12  ;;  %1759 = vmatmul.mubr.msk.bf16.vlgmr.msra.gmra.mrb[4].mxu0 %vm738_vm2, %v730_v22 }
 0x1e6   : > { %1770 = vmatprep.mubr.msk.bf16.mxu0 %vm2299_vm0, %v2298_v0 }
 0x24f   : > { %v853_v24 = vpop.permute.xlu0 %852 }
 0x250   : > { %v858_v25 = vsel %vm738_vm2, %v853_v24, 0 }
 0x251   : > { %1769 = vmatpush3.bf16.xpose.msra.mxu0 %v858_v25 }
 0x252   : > { %1780 = vmatprep.subr.bf16.mxu0 %v2298_v0 }
 0x253   : > { %v851_v26 = vpop.permute.xlu0 %850 }
 0x257   : > { %v798_v27 = vpop.permute.xlu0 %797 }
 0x258   : > { %v804_v28 = vsel %vm802_vm3, %v798_v27, 0  ;;  %1771 = vmatmul.mubr.msk.bf16.vlgmr.msra.gmra.mrb[8].mxu0 %vm738_vm2, %v851_v26 }
 0x259   : > { %1763 = vmatpush3.bf16.msra.mxu1 %v804_v28  ;;  %1782 = vmatprep.mubr.msk.bf16.mxu0 %vm2299_vm0, %v2298_v0 }
 0x25a   : > { %1774 = vmatprep.subr.bf16.mxu1 %v2298_v0  ;;  %1781 = vmatpush3.bf16.msra.mxu0 %v966_v1 }
 0x25b   : > { %1792 = vmatprep.subr.bf16.mxu0 %v2298_v0 }
 0x2b8   : > { %v779_v35 = vpop.f32.mrb[4].mxu0 }
 0x2b9   : > { %v780_v36 = vadd.f32 %v779_v35, %v2733_v34  ;;  %v1760_v37 = vpop.f32.mrb[5].mxu0 }
 0x2ba   : > { %v782_v38 = vpop.f32.mrb[6].mxu0 }
 0x2bb   : > { %v1761_v39 = vpop.f32.mrb[7].mxu0  ;;  %v785_v40 = vsel %vm738_vm2, %v780_v36, -inf }
 0x2bc   : > { %786 = vmax.xlane.f32.xlu1 %v785_v40 }
 0x32b   : > { %v894_v41 = vpop.f32.mrb[8].mxu0 }
 0x32c   : > { %v895_v42 = vadd.f32 %v894_v41, %v2733_v34  ;;  %v1772_v43 = vpop.f32.mrb[9].mxu0 }
 0x32d   : > { %v897_v44 = vpop.f32.mrb[10].mxu0 }
 0x32e   : > { %v1773_v45 = vpop.f32.mrb[11].mxu0  ;;  %v900_v46 = vsel %vm738_vm2, %v895_v42, -inf }
 0x32f   : > { %901 = vmax.xlane.f32.xlu1 %v900_v46 }
 0x340   : > { %911 = vrot.lane.b32.xlu1 %v2711_v18, %s2302_s20 }
 0x344   : > { %1056 = vrot.lane.b32.xlu1 %v2711_v18, %s2303_s18 }
 0x348   : > { %1054 = vrot.lane.b32.xlu1 %v730_v22, %s2303_s18 }
 0x349   : > { %v787_v47 = vpop.xlane.xlu1 %786 }
 0x34a   : > { %v788_v48 = vsub.f32 %v780_v36, %v787_v47 }
 0x34c   : > { %v789_v49 = vmul.f32 1.442695, %v788_v48 }
 0x34e   : > { %1971 = vpow2.f32 %v789_v49 }
 0x358   : > { %v1972_v50 = vpop.eup %1971 }
 0x359   : > { %v795_v51 = vpack.c.bf16 %v1972_v50, %v1972_v50  ;;  %v791_v52 = vsel %vm738_vm2, %v1972_v50, 0.0  ;;  %v1165_v50 = vld [vmem:[#allocation11 + $0x8] sm:$0xf] }
 0x35b   : > { %1765 = vmatmul.mubr.msk.bf16.vlgmr.msra.gmra.mrb[4].mxu1 %vm738_vm2, %v795_v51  ;;  %v1170_v51 = vsel %vm802_vm3, %v1165_v50, 0 }
 0x35c   : > { %1776 = vmatprep.mubr.msk.bf16.mxu1 %vm2299_vm0, %v2298_v0 }
 0x36c   : > { %792 = vadd.xlane.f32.xlu1 %v791_v52 }
 0x37d   : > { %1213 = vrot.lane.b32.xlu1 %v730_v22, %s2304_s15 }
 0x3bc   : > { %v902_v53 = vpop.xlane.xlu1 %901 }
 0x3bd   : > { %v903_v54 = vsub.f32 %v895_v42, %v902_v53 }
 0x3bf   : > { %v904_v55 = vmul.f32 1.442695, %v903_v54 }
 0x3c0   : > { %v912_v56 = vpop.permute.xlu1 %911 }
 0x3c1   : > { %1973 = vpow2.f32 %v904_v55  ;;  %v917_v57 = vsel %vm802_vm3, %v912_v56, 0 }
 0x3c2   : > { %1775 = vmatpush3.bf16.msra.mxu1 %v917_v57 }
 0x3c3   : > { %1786 = vmatprep.subr.bf16.mxu1 %v2298_v0 }
 0x3c4   : > { %v1057_v2 = vpop.permute.xlu1 %1056 }
 0x3c5   : > { %v1062_v24 = vsel %vm738_vm2, %v1057_v2, 0 }
 0x3c8   : > { %v1055_v3 = vpop.permute.xlu1 %1054 }
 0x3cb   : > { %v1974_v59 = vpop.eup %1973 }
 0x3cc   : > { %v906_v60 = vsel %vm738_vm2, %v1974_v59, 0.0  ;;  %v910_v61 = vpack.c.bf16 %v1974_v59, %v1974_v59 }
 0x3cd   : > { %907 = vadd.xlane.f32.xlu0 %v906_v60 }
 0x3ce   : > { %1777 = vmatmul.mubr.msk.bf16.vlgmr.msra.gmra.mrb[8].mxu1 %vm738_vm2, %v910_v61 }
 0x3cf   : > { %1787 = vmatpush3.bf16.msra.mxu1 %v1012_v62  ;;  %1788 = vmatprep.mubr.msk.bf16.mxu1 %vm2299_vm0, %v2298_v0 }
 0x3d0   : > { %1798 = vmatprep.subr.bf16.mxu1 %v2298_v0 }
 0x3e3   : > { %1115 = vrot.lane.b32.xlu0 %v2711_v18, %s2305_s11  ;;  %s1704_s11 = sshll.u32 %s2932_s2, 7 }
 0x3e4   : > { %s2827_s12 = scalar_lea.hbm %s2938_s19, %s1704_s11 }
 0x3f9   : > { %v793_v4 = vpop.xlane.xlu1 %792 }
 0x3fa   : > { %1975 = vrcp.f32 %v793_v4 }
 0x3fd   : > { %v1214_v49 = vpop.permute.xlu1 %1213 }
 0x404   : > { %v1976_v5 = vpop.eup %1975 }
 0x42e   : > { %v840_v7 = vpop.f32.mrb[4].mxu1 }
 0x42f   : > { %v846_v8 = vmul.f32 %v1976_v5, %v840_v7  ;;  %v1766_v9 = vpop.f32.mrb[5].mxu1 }
 0x430   : > { %v843_v10 = vpop.f32.mrb[6].mxu1 }
 0x431   : > { %v847_v11 = vpack.c.bf16 %v846_v8, %v846_v8  ;;  %v1767_v12 = vpop.f32.mrb[7].mxu1 }
 0x433   : > { %1789 = vmatmul.mubr.msk.bf16.vlgmr.msra.gmra.mrb[12].mxu1 %vm738_vm2, %v847_v11 }
 0x434   : > { %1800 = vmatprep.mubr.msk.bf16.mxu1 %vm2299_vm0, %v2298_v0 }
 0x45a   : > { %v908_v13 = vpop.xlane.xlu0 %907 }
 0x45b   : > { %1977 = vrcp.f32 %v908_v13 }
 0x45e   : > { %v1116_v14 = vpop.permute.xlu0 %1115 }
 0x45f   : > { %v1121_v15 = vsel %vm802_vm3, %v1116_v14, 0 }
 0x460   : > { %1799 = vmatpush3.bf16.msra.mxu1 %v1121_v15 }
 0x461   : > { %1810 = vmatprep.subr.bf16.mxu1 %v2298_v0 }
 0x465   : > { %v1978_v16 = vpop.eup %1977 }
 0x4a1   : > { %v953_v17 = vpop.f32.mrb[8].mxu1 }
 0x4a2   : > { %v959_v19 = vmul.f32 %v1978_v16, %v953_v17  ;;  %v1778_v20 = vpop.f32.mrb[9].mxu1 }
 0x4a3   : > { %v956_v21 = vpop.f32.mrb[10].mxu1 }
 0x4a4   : > { %v960_v22 = vpack.c.bf16 %v959_v19, %v959_v19  ;;  %v1779_v23 = vpop.f32.mrb[11].mxu1 }
 0x4a6   : > { %1783 = vmatmul.mubr.msk.bf16.vlgmr.msra.gmra.mrb[12].mxu0 %vm738_vm2, %v960_v22 }
 0x4a7   : > { %1793 = vmatpush3.bf16.xpose.msra.mxu0 %v1062_v24  ;;  %1794 = vmatprep.mubr.msk.bf16.mxu0 %vm2299_vm0, %v2298_v0 }
 0x4a8   : > { %1804 = vmatprep.subr.bf16.mxu0 %v2298_v0 }
 0x4ae   : > { %1795 = vmatmul.mubr.msk.bf16.vlgmr.msra.gmra.mrb[16].mxu0 %vm738_vm2, %v1055_v3 }
 0x4af   : > { %1806 = vmatprep.mubr.msk.bf16.mxu0 %vm2299_vm0, %v2298_v0  ;;  %1805 = vmatpush3.bf16.msra.mxu0 %v1170_v51 }
 0x4b0   : > { %1816 = vmatprep.subr.bf16.mxu0 %v2298_v0 }
 0x506   : > { %v1048_v25 = vpop.f32.mrb[12].mxu1 }
 0x507   : > { %v1790_v26 = vpop.f32.mrb[13].mxu1 }
 0x508   : > { %v1051_v27 = vpop.f32.mrb[14].mxu1  ;;  %v1969_v26 = vld [vmem:[%s2934_s14] sm:$0xff]  }
 0x509   : > { %v1791_v28 = vpop.f32.mrb[15].mxu1  ;;  %v1970_v27 = vld [vmem:[%s2934_s14 + $0x8] sm:$0xff]  }
 0x579   : > { %v1002_v29 = vpop.f32.mrb[12].mxu0 }
 0x57a   : > { %v2770_v30 = vadd.f32 %v1048_v25, %v1002_v29  ;;  %v1784_v31 = vpop.f32.mrb[13].mxu0  ;;  %v1696_v29 = vld [vmem:[#allocation13] ss:$0 sm:$0xff] }
 0x57b   : > { %v1005_v32 = vpop.f32.mrb[14].mxu0 }
 0x57c   : > { %v1785_v33 = vpop.f32.mrb[15].mxu0 }
 0x581   : > { %v1098_v35 = vpop.f32.mrb[16].mxu0 }
 0x582   : > { %v1099_v36 = vadd.f32 %v1098_v35, %v2733_v34  ;;  %v1796_v37 = vpop.f32.mrb[17].mxu0 }
 0x583   : > { %v1101_v38 = vpop.f32.mrb[18].mxu0  ;;  %v1697_v37 = vld [vmem:[%s2935_s4] ss:$0 sm:$0xff] }
 0x584   : > { %v1797_v39 = vpop.f32.mrb[19].mxu0  ;;  %v1104_v40 = vsel %vm738_vm2, %v1099_v36, -inf }
 0x585   : > { %1105 = vmax.xlane.f32.xlu0 %v1104_v40 }
 0x59b   : > { %1215 = vrot.lane.b32.xlu0 %v2711_v18, %s2304_s15  ;;  %s2937_s15 = sld [smem:[#allocation31_spill]] }
 0x612   : > { %v1106_v41 = vpop.xlane.xlu0 %1105 }
 0x613   : > { %v1107_v42 = vsub.f32 %v1099_v36, %v1106_v41 }
 0x615   : > { %v1108_v43 = vmul.f32 1.442695, %v1107_v42 }
 0x616   : > { %v1216_v45 = vpop.permute.xlu0 %1215 }
 0x617   : > { %1979 = vpow2.f32 %v1108_v43  ;;  %v1221_v48 = vsel %vm738_vm2, %v1216_v45, 0 }
 0x621   : > { %v1980_v44 = vpop.eup %1979 }
 0x622   : > { %v1110_v46 = vsel %vm738_vm2, %v1980_v44, 0.0  ;;  %v1114_v47 = vpack.c.bf16 %v1980_v44, %v1980_v44 }
 0x623   : > { %1111 = vadd.xlane.f32.xlu0 %v1110_v46 }
 0x624   : > { %1801 = vmatmul.mubr.msk.bf16.vlgmr.msra.gmra.mrb[16].mxu1 %vm738_vm2, %v1114_v47 }
 0x625   : > { %1811 = vmatpush3.bf16.xpose.msra.mxu1 %v1221_v48  ;;  %1812 = vmatprep.mubr.msk.bf16.mxu1 %vm2299_vm0, %v2298_v0 }
 0x626   : > { %1822 = vmatprep.subr.bf16.mxu1 %v2298_v0 }
 0x62c   : > { %1813 = vmatmul.mubr.msk.bf16.vlgmr.msra.gmra.mrb[20].mxu1 %vm738_vm2, %v1214_v49 }
 0x62d   : > { %1824 = vmatprep.mubr.msk.bf16.mxu1 %vm2299_vm0, %v2298_v0 }
 0x639   : > { %1274 = vrot.lane.b32.xlu0 %v2711_v18, %s2306_s17  ;;  %s586_s17 = scalar_lea.vmem [#allocation14], %s2659_s6  ;;  %s2307_s6 = smov [#allocation14]  }
 0x63a   : > { %s1495_s16 = sshll.u32 %s586_s17, 4  ;;  %s2193_s2 = sshll.u32 %s2307_s6, 4  ;;  %s2829_s16 = int_to_ptr.vmem [resolvable:$true] %s1495_s16  ;;  %s2194_s2 = int_to_ptr.vmem [resolvable:$false] %s2193_s2 }
 0x63b   : > { %s2189_s4 = scalar_lea.vmem %s2829_s16, 128  ;;  %s2195_s21 = scalar_lea.vmem %s2194_s2, 256 }
 0x63c   : > { %p2190_p0 = scmp.ne.s32.totalorder %s2829_s16, %s2189_s4  ;;  %p2196_p4 = scmp.lt.s32.totalorder %s2829_s16, %s2194_s2 }
 0x63d   : > { %p2197_p11 = scmp.lt.s32.totalorder %s2195_s21, %s2189_s4 }
 0x63e   : > { %p2191_p5 = pnand %p2190_p0, %p2939_p7 }
 0x63f   : > { %p2198_p6 = por %p2197_p11, %p2196_p4 }
 0x640   : > { %p2192_p2 = pneg %p2191_p5 }
 0x642   : > { %p2199_p10 = pnand %p2198_p6, %p2192_p2 }
 0x6b0   : > { %v1112_v52 = vpop.xlane.xlu0 %1111 }
 0x6b1   : > { %1981 = vrcp.f32 %v1112_v52 }
 0x6b4   : > { %v1275_v57 = vpop.permute.xlu0 %1274 }
 0x6b5   : > { %v1280_v61 = vsel %vm802_vm3, %v1275_v57, 0 }
 0x6bb   : > { %v1982_v53 = vpop.eup %1981 }
 0x6f7   : > { %v1157_v54 = vpop.f32.mrb[16].mxu1 }
 0x6f8   : > { %v1163_v55 = vmul.f32 %v1982_v53, %v1157_v54  ;;  %v1802_v56 = vpop.f32.mrb[17].mxu1  ;;  %v1702_v54 = vld [vmem:[%s2937_s15] ss:$0 sm:$0xff] }
 0x6f9   : > { %v1160_v58 = vpop.f32.mrb[18].mxu1 }
 0x6fa   : > { %v1164_v59 = vpack.c.bf16 %v1163_v55, %v1163_v55  ;;  %v1803_v60 = vpop.f32.mrb[19].mxu1 }
 0x6fc   : > { %1807 = vmatmul.mubr.msk.bf16.vlgmr.msra.gmra.mrb[20].mxu0 %vm738_vm2, %v1164_v59 }
 0x6fd   : > { %1817 = vmatpush3.bf16.msra.mxu0 %v1280_v61  ;;  %1818 = vmatprep.mubr.msk.bf16.mxu0 %vm2299_vm0, %v2298_v0 }
 0x6fe   : > { %1828 = vmatprep.subr.bf16.mxu0 %v2298_v0 }
 0x6ff   : > { %v1257_v18 = vpop.f32.mrb[20].mxu1 }
 0x700   : > { %v1258_v62 = vadd.f32 %v1257_v18, %v2733_v34  ;;  %v1814_v63 = vpop.f32.mrb[21].mxu1  ;;  %v1324_v34 = vld [vmem:[#allocation11 + $0xc] sm:$0xf] }
 0x701   : > { %v1260_v1 = vpop.f32.mrb[22].mxu1  ;;  %v1329_v11 = vsel %vm802_vm3, %v1324_v34, 0 }
 0x702   : > { %v1815_v2 = vpop.f32.mrb[23].mxu1  ;;  %v1263_v3 = vsel %vm738_vm2, %v1258_v62, -inf  ;;  %1823 = vmatpush3.bf16.msra.mxu1 %v1329_v11 }
 0x703   : > { %1264 = vmax.xlane.f32.xlu1 %v1263_v3 }
 0x790   : > { %v1265_v4 = vpop.xlane.xlu1 %1264 }
 0x791   : > { %v1266_v5 = vsub.f32 %v1258_v62, %v1265_v4 }
 0x793   : > { %v1267_v7 = vmul.f32 1.442695, %v1266_v5 }
 0x795   : > { %1983 = vpow2.f32 %v1267_v7 }
 0x79f   : > { %v1984_v8 = vpop.eup %1983 }
 0x7a0   : > { %v1269_v9 = vsel %vm738_vm2, %v1984_v8, 0.0  ;;  %v1273_v10 = vpack.c.bf16 %v1984_v8, %v1984_v8 }
 0x7a1   : > { %1270 = vadd.xlane.f32.xlu1 %v1269_v9 }
 0x7a2   : > { %1819 = vmatmul.mubr.msk.bf16.vlgmr.msra.gmra.mrb[24].mxu0 %vm738_vm2, %v1273_v10 }
 0x7a3   : > { %1832 = vmatprep.mubr.msk.bf16.mxu0 %vm2299_vm0, %v2298_v0  ;;  %1829 = vmatpush3.bf16.msra.mxu0 %v1969_v26 }
 0x7a4   : > { %1830 = vmatprep.subr.bf16.mxu0 %v2298_v0 }
 0x7a7   : > { %1831 = vmatpush3.bf16.msra.mxu0 %v1970_v27 }
 0x7cf   : > { %v1206_v12 = vpop.f32.mrb[20].mxu0 }
 0x7d0   : > { %v1212_v13 = vadd.f32 %v1206_v12, %v2770_v30  ;;  %v1808_v14 = vpop.f32.mrb[21].mxu0 }
 0x7d1   : > { %v1209_v15 = vpop.f32.mrb[22].mxu0 }
 0x7d2   : > { %v1809_v16 = vpop.f32.mrb[23].mxu0 }
 0x82e   : > { %v1271_v17 = vpop.xlane.xlu1 %1270 }
 0x82f   : > { %1985 = vrcp.f32 %v1271_v17 }
 0x839   : > { %v1986_v19 = vpop.eup %1985 }
 0x875   : > { %v1316_v20 = vpop.f32.mrb[24].mxu0 }
 0x876   : > { %v1322_v21 = vmul.f32 %v1986_v19, %v1316_v20  ;;  %v1820_v22 = vpop.f32.mrb[25].mxu0 }
 0x877   : > { %v1319_v23 = vpop.f32.mrb[26].mxu0 }
 0x878   : > { %v1323_v24 = vpack.c.bf16 %v1322_v21, %v1322_v21  ;;  %v1821_v25 = vpop.f32.mrb[27].mxu0 }
 0x87a   : > { %1825 = vmatmul.mubr.msk.bf16.vlgmr.msra.gmra.mrb[24].mxu1 %vm738_vm2, %v1323_v24 }
 0x94d   : > { %v1365_v28 = vpop.f32.mrb[24].mxu1 }
 0x94e   : > { %v1371_v30 = vadd.f32 %v1365_v28, %v1212_v13  ;;  %v1826_v31 = vpop.f32.mrb[25].mxu1 }
 0x94f   : > { %v1368_v32 = vpop.f32.mrb[26].mxu1 }
 0x950   : > { %v1379_v33 = vadd.f32 %v1696_v29, %v1371_v30  ;;  %v1827_v35 = vpop.f32.mrb[27].mxu1 }
 0x952   : > { %v1380_v36 = vpack.c.bf16 %v1379_v33, %v1379_v33 }
 0x954   : > { %1833 = vmatmul.mubr.msk.bf16.vlgmr.msra.gmra.mrb[28].mxu0 %vm618_vm1, %v1380_v36 }
 0xa27   : > { %v1441_v0 = vpop.f32.mrb[28].mxu0 }
 0xa28   : > { %v1442_v38 = vadd.f32 %v1697_v37, %v1441_v0  ;;  %v1834_v39 = vpop.f32.mrb[29].mxu0 }
 0xa29   : > { %v1444_v40 = vpop.f32.mrb[30].mxu0 }
 0xa2a   : > { %v1835_v41 = vpop.f32.mrb[31].mxu0  ;;  %v1447_v42 = vadd.f32 %v1442_v38, %v2699_v6  ;;  %v1701_v6 = vld [vmem:[%s2936_s22] ss:$0 sm:$0xff] }
 0xa2c   : > { %v1448_v43 = vsel %vm618_vm1, %v1447_v42, 0.0 }
 0xa2d   : > { %1449 = vadd.xlane.f32.xlu0 %v1448_v43 }
 0xaba   : > { %v1450_v44 = vpop.xlane.xlu0 %1449 }
 0xabb   : > { %v1452_v45 = vmul.f32 0.03125, %v1450_v44 }
 0xabd   : > { %v1453_v46 = vsub.f32 %v1447_v42, %v1452_v45 }
 0xabf   : > { %v1454_v47 = vmul.f32 %v1453_v46, %v1453_v46 }
 0xac1   : > { %v1455_v48 = vsel %vm618_vm1, %v1454_v47, 0.0 }
 0xac2   : > { %1456 = vadd.xlane.f32.xlu1 %v1455_v48 }
 0xb4f   : > { %v1457_v49 = vpop.xlane.xlu1 %1456 }
 0xb50   : > { %v1458_v50 = vmul.f32 0.03125, %v1457_v49 }
 0xb52   : > { %v1459_v51 = vadd.f32 1e-12, %v1458_v50 }
 0xb54   : > { %1987 = vrsqrt.f32 %v1459_v51 }
 0xb5e   : > { %v1988_v52 = vpop.eup %1987 }
 0xb5f   : > { %v1461_v53 = vmul.f32 %v1988_v52, %v1453_v46 }
 0xb61   : > { %v1469_v55 = vmul.f32 %v1701_v6, %v1461_v53 }
 0xb63   : > { %v1477_v56 = vadd.f32 %v1702_v54, %v1469_v55 }
 0xb65   : > { %v1478_v57 = vadd.f32 %v1477_v56, %v1379_v33 }
 0xb67   : > { %1479 = vst.msk [vmem:[%s586_s17] sm:$0xff] %vm618_vm1, %v1478_v57 }
 0xb68   : > { %2202 = shalt.err (!%p2199_p10)
}
 0xb69   : > { %s2203_s9 = scalar_lea.hbm %s2827_s12, 128  ;;  %s2207_s20 = scalar_lea.hbm %s2938_s19, 256 }
 0xb6a   : > { %p2204_p1 = scmp.ne.s32.totalorder %s2827_s12, %s2203_s9  ;;  %p2208_p3 = scmp.lt.u32.totalorder %s2827_s12, %s2938_s19 }
 0xb6b   : > { %p2209_p12 = scmp.lt.u32.totalorder %s2207_s20, %s2203_s9  ;;  %p2211_p0 = scmp.lt.u32.totalorder %s2203_s9, %s2827_s12 }
 0xb6c   : > { %p2205_p9 = pnand %p2204_p1, %p2939_p7 }
 0xb6d   : > { %p2210_p13 = por %p2209_p12, %p2208_p3 }
 0xb6e   : > { %p2206_p8 = pneg %p2205_p9 }
 0xb6f   : > { %p2212_p5 = por %p2211_p0, %p2210_p13 }
 0xb71   : > { %p2213_p2 = pnand %p2212_p5, %p2206_p8 }
 0xb73   : > { %2216 = shalt.err (!%p2213_p2)
}
 0xb74   : > { %1860 = dma.vmem_to_hbm [thread:$0]  (%p2939_p7), %s2829_s16, 128, %s2827_s12, %s1481_s8  }
 0xb75 PF: > { %s1507_s11 = sand.u32 1, %s2267_s25   ;;  %p2940_p4 = scmp.ne.s32.totalorder %s2922_s24, 0 }
 0xb76   : > { %p2941_p11 = scmp.ge.s32.totalorder %s2287_s30, 2  ;;  %s1508_s17 = scalar_lea.sflag [#allocation4], %s1507_s11 }
 0xb78   : > { %p1886_p6 = pnand %p2941_p11, %p2940_p4 }
 0xb7a   : > { %2262 = dma.done.wait (!%p1886_p6), %s1508_s17, 128  }
 0xb7b   : > { %2264 = vsyncadd (!%p1886_p6), %s1508_s17, 4294967168  ;;  %s34_s30 = sadd.s32 1, %s2287_s30   ;;  %s2942_s25 = smov %s2271_s26 }
 0xb7c   : > { %p31_p10 = scmp.ge.s32.totalorder %s34_s30, 4   ;;  %s2943_s26 = smov %s2275_s27 }
 0xb7d   : > { %s2944_s27 = smov %s2576_s10  ;;  %s2945_s28 = smov %s2283_s29 }
 0xb7e   : > { %s2946_s29 = smov %s2948_s13  ;;  %33 = sbr.rel (!%p31_p10) target bundleno = 22 (0x16), region = 153 }
 0xb85   :  { %1513 = vsyncpa [#allocation3], 1 }
 0xb86   :  { %1515 = vsyncpa [#allocation3 + $0x1], 1 }
 0xb87   :  { %1516 = vsyncpa [#allocation6], 1 }
 0xb88   :  { %1518 = vsyncpa [#allocation6 + $0x1], 1 }
 0xb89   :  { %1519 = vsyncpa [#allocation9], 1 }
 0xb8a   :  { %1520 = vsyncpa [#allocation12], 1 }
 0xb8b   :  { %1521 = vsyncpa [#allocation4], 1 }
 0xb8c   :  { %1523 = vsyncpa [#allocation4 + $0x1], 1 }

</bundles_post_ra>
